<compile_context>
chip_gen: v6e
topology: v6e:2x2x1
jax: 0.10.0
libtpu: 0.0.40
codegen_flags: <defaults>
</compile_context>

<pallas_src>
import jax
import jax.numpy as jnp
from jax.experimental import pallas as pl
from jax.experimental.pallas import tpu as pltpu

# Model dims (PyTorch Network: 784 -> 128 -> 64 -> 10)
K_IN = 784           # fc1 in_features
K_PAD = 896          # 7 * 128, lane-aligned K for fc1
H1 = 128             # fc1 out_features
H2 = 64              # fc2 out_features
N_OUT = 10           # fc3 out_features (real classes)
N_PAD = 128          # lane-dense padded output width

DEFAULT_TILE_B = 128  # multiple of 128: MXU-row aligned, fits scoped VMEM on all gens


def _sigmoid(z):
    # exp + reciprocal both go to the EUP slot -> keeps the VALU free.
    return pl.reciprocal(1.0 + jnp.exp(-z), approx=True)


def mlp_kernel(x_ref, w1_ref, b1_ref, w2_ref, b2_ref, w3_ref, b3_ref, o_ref):
    # x tile: (TILE_B, K_PAD) bf16; weights bf16; biases f32.
    x = x_ref[...]

    # fc1 + sigmoid (f32 accumulation on the MXU)
    h1 = jnp.dot(x, w1_ref[...], preferred_element_type=jnp.float32)
    h1 = _sigmoid(h1 + b1_ref[...])                       # (TILE_B, 128) f32

    # fc2 + sigmoid
    h2 = jnp.dot(h1.astype(jnp.bfloat16), w2_ref[...],
                 preferred_element_type=jnp.float32)
    h2 = _sigmoid(h2 + b2_ref[...])                       # (TILE_B, 64) f32

    # fc3 (padded to 128 lanes) + softmax over the feature axis
    z = jnp.dot(h2.astype(jnp.bfloat16), w3_ref[...],
                preferred_element_type=jnp.float32)
    z = z + b3_ref[...]                                   # pad columns biased to -1e30
    m = jnp.max(z, axis=-1, keepdims=True)
    e = jnp.exp(z - m)                                    # pad columns -> exp(~-1e30) == 0
    denom = jnp.sum(e, axis=-1, keepdims=True)
    o_ref[...] = e * pl.reciprocal(denom, approx=True)    # lane-dense (TILE_B, 128) store


def network_forward(x, params, *, tile_b=DEFAULT_TILE_B, vmem_limit_bytes=None):
    """x: (B, 784) float array; params: output of prepare_params(). Returns (B, 10) f32."""
    w1, b1, w2, b2, w3, b3 = params
    B = x.shape[0]
    assert x.shape[1] == K_IN

    # Pad batch to a multiple of tile_b, pad K to 896, cast the x stream to bf16.
    num_tiles = pl.cdiv(B, tile_b)
    b_pad = num_tiles * tile_b
    x_p = jnp.zeros((b_pad, K_PAD), jnp.bfloat16)
    x_p = x_p.at[:B, :K_IN].set(x.astype(jnp.bfloat16))

    out = pl.pallas_call(
        mlp_kernel,
        out_shape=jax.ShapeDtypeStruct((b_pad, N_PAD), jnp.float32),
        grid=(num_tiles,),
        in_specs=[
            pl.BlockSpec((tile_b, K_PAD), lambda i: (i, 0)),   # x: tiled over batch
            pl.BlockSpec((K_PAD, H1), lambda i: (0, 0)),       # weights/biases: resident
            pl.BlockSpec((1, H1), lambda i: (0, 0)),
            pl.BlockSpec((H1, H2), lambda i: (0, 0)),
            pl.BlockSpec((1, H2), lambda i: (0, 0)),
            pl.BlockSpec((H2, N_PAD), lambda i: (0, 0)),
            pl.BlockSpec((1, N_PAD), lambda i: (0, 0)),
        ],
        out_specs=pl.BlockSpec((tile_b, N_PAD), lambda i: (i, 0)),
        compiler_params=pltpu.CompilerParams(
            dimension_semantics=("parallel",),   # shard batch axis across TCs on v7x
            vmem_limit_bytes=vmem_limit_bytes,   # set when using tiles > scoped default
        ),
    )(x_p, w1, b1, w2, b2, w3, b3)

    return out[:B, :N_OUT]


def init_params(key):
    """Deterministic synthetic f32 params, stored as (in_features, out_features)."""
    k1, k2, k3, k4, k5, k6 = jax.random.split(key, 6)
    w1 = jax.random.normal(k1, (K_IN, H1), jnp.float32) * (1.0 / jnp.sqrt(float(K_IN)))
    b1 = jax.random.normal(k2, (1, H1), jnp.float32) * 0.01
    w2 = jax.random.normal(k3, (H1, H2), jnp.float32) * (1.0 / jnp.sqrt(float(H1)))
    b2 = jax.random.normal(k4, (1, H2), jnp.float32) * 0.01
    w3 = jax.random.normal(k5, (H2, N_OUT), jnp.float32) * (1.0 / jnp.sqrt(float(H2)))
    b3 = jax.random.normal(k6, (1, N_OUT), jnp.float32) * 0.01
    return (w1, b1, w2, b2, w3, b3)


def prepare_params(raw_params):
    """Pad + cast once: K->896 for w1, N->128 for w3 (pad bias -1e30), bf16 weights."""
    w1, b1, w2, b2, w3, b3 = raw_params
    w1p = jnp.zeros((K_PAD, H1), jnp.float32).at[:K_IN, :].set(w1).astype(jnp.bfloat16)
    w2p = w2.astype(jnp.bfloat16)
    w3p = jnp.zeros((H2, N_PAD), jnp.float32).at[:, :N_OUT].set(w3).astype(jnp.bfloat16)
    b3p = jnp.full((1, N_PAD), -1e30, jnp.float32).at[:, :N_OUT].set(b3)
    return (w1p, b1, w2p, b2, w3p, b3p)


def reference_forward(x, raw_params):
    """Pure-JAX f32 reference matching the PyTorch module."""
    w1, b1, w2, b2, w3, b3 = raw_params
    h1 = jax.nn.sigmoid(x @ w1 + b1)
    h2 = jax.nn.sigmoid(h1 @ w2 + b2)
    return jax.nn.softmax(h2 @ w3 + b3, axis=1)


if __name__ == "__main__":
    key = jax.random.PRNGKey(0)
    kx, kp = jax.random.split(key)

    B = 32
    x = jax.random.normal(kx, (B, K_IN), jnp.float32)
    raw = init_params(kp)
    params = prepare_params(raw)

    out = jax.block_until_ready(network_forward(x, params))
    ref = reference_forward(x, raw)

    assert out.shape == (B, N_OUT)
    assert bool(jnp.all(jnp.isfinite(out)))
    # bf16 matmul inputs + approx EUP reciprocals -> loose tolerance vs f32 reference.
    assert jnp.allclose(out, ref, atol=3e-2, rtol=0), "mismatch vs f32 reference"
    assert jnp.allclose(jnp.sum(out, axis=1), 1.0, atol=1e-2), "softmax rows must sum to ~1"

    print("KERNEL_OK")
</pallas_src>

<mosaic_0001>
module attributes {stable_mosaic.version = 11 : i64} {
  func.func @mlp_kernel(%arg0: i32, %arg1: memref<128x896xbf16, #tpu.memory_space<vmem>>, %arg2: memref<896x128xbf16, #tpu.memory_space<vmem>>, %arg3: memref<1x128xf32, #tpu.memory_space<vmem>>, %arg4: memref<128x64xbf16, #tpu.memory_space<vmem>>, %arg5: memref<1x64xf32, #tpu.memory_space<vmem>>, %arg6: memref<64x128xbf16, #tpu.memory_space<vmem>>, %arg7: memref<1x128xf32, #tpu.memory_space<vmem>>, %arg8: memref<128x128xf32, #tpu.memory_space<vmem>>) attributes {dimension_semantics = [#tpu.dimension_semantics<parallel>], iteration_bounds = array<i64: 1>, scalar_prefetch = 0 : i64, scratch_operands = 0 : i64, tpu.core_type = #tpu.core_type<tc>, window_params = [{transform_indices = @transform_0, window_bounds = array<i64: 128, 896>}, {pipeline_mode = #tpu.pipeline_mode<synchronous>, transform_indices = @transform_1, window_bounds = array<i64: 896, 128>}, {pipeline_mode = #tpu.pipeline_mode<synchronous>, transform_indices = @transform_2, window_bounds = array<i64: 1, 128>}, {pipeline_mode = #tpu.pipeline_mode<synchronous>, transform_indices = @transform_3, window_bounds = array<i64: 128, 64>}, {pipeline_mode = #tpu.pipeline_mode<synchronous>, transform_indices = @transform_4, window_bounds = array<i64: 1, 64>}, {pipeline_mode = #tpu.pipeline_mode<synchronous>, transform_indices = @transform_5, window_bounds = array<i64: 64, 128>}, {pipeline_mode = #tpu.pipeline_mode<synchronous>, transform_indices = @transform_6, window_bounds = array<i64: 1, 128>}, {transform_indices = @transform_7, window_bounds = array<i64: 128, 128>}]} {
    %c0 = arith.constant 0 : index
    %c0_0 = arith.constant 0 : index
    %0 = vector.load %arg1[%c0, %c0_0] : memref<128x896xbf16, #tpu.memory_space<vmem>>, vector<128x896xbf16>
    %c0_1 = arith.constant 0 : index
    %c0_2 = arith.constant 0 : index
    %1 = vector.load %arg2[%c0_1, %c0_2] : memref<896x128xbf16, #tpu.memory_space<vmem>>, vector<896x128xbf16>
    %cst = arith.constant dense<0.000000e+00> : vector<128x128xf32>
    %2 = tpu.matmul %0, %1, %cst {dimension_numbers = #tpu.dot_dimension_numbers<[1], [0], [0], [1], [0, 0, 1, 1], [], []>} : vector<128x896xbf16>, vector<896x128xbf16>, vector<128x128xf32> -> vector<128x128xf32>
    %c0_3 = arith.constant 0 : index
    %c0_4 = arith.constant 0 : index
    %3 = vector.load %arg3[%c0_3, %c0_4] : memref<1x128xf32, #tpu.memory_space<vmem>>, vector<1x128xf32>
    %4 = vector.broadcast %3 : vector<1x128xf32> to vector<128x128xf32>
    %5 = arith.addf %2, %4 : vector<128x128xf32>
    %cst_5 = arith.constant 0.000000e+00 : f32
    %6 = vector.broadcast %cst_5 : f32 to vector<128x128xf32>
    %7 = arith.subf %6, %5 : vector<128x128xf32>
    %8 = math.exp %7 : vector<128x128xf32>
    %cst_6 = arith.constant 1.000000e+00 : f32
    %9 = vector.broadcast %cst_6 : f32 to vector<128x128xf32>
    %10 = arith.addf %9, %8 : vector<128x128xf32>
    %11 = tpu.reciprocal %10 {approx = true} : vector<128x128xf32> -> vector<128x128xf32>
    %12 = arith.truncf %11 : vector<128x128xf32> to vector<128x128xbf16>
    %c0_7 = arith.constant 0 : index
    %c0_8 = arith.constant 0 : index
    %13 = vector.load %arg4[%c0_7, %c0_8] : memref<128x64xbf16, #tpu.memory_space<vmem>>, vector<128x64xbf16>
    %cst_9 = arith.constant dense<0.000000e+00> : vector<128x64xf32>
    %14 = tpu.matmul %12, %13, %cst_9 {dimension_numbers = #tpu.dot_dimension_numbers<[1], [0], [0], [1], [0, 0, 1, 1], [], []>} : vector<128x128xbf16>, vector<128x64xbf16>, vector<128x64xf32> -> vector<128x64xf32>
    %c0_10 = arith.constant 0 : index
    %c0_11 = arith.constant 0 : index
    %15 = vector.load %arg5[%c0_10, %c0_11] : memref<1x64xf32, #tpu.memory_space<vmem>>, vector<1x64xf32>
    %16 = vector.broadcast %15 : vector<1x64xf32> to vector<128x64xf32>
    %17 = arith.addf %14, %16 : vector<128x64xf32>
    %cst_12 = arith.constant 0.000000e+00 : f32
    %18 = vector.broadcast %cst_12 : f32 to vector<128x64xf32>
    %19 = arith.subf %18, %17 : vector<128x64xf32>
    %20 = math.exp %19 : vector<128x64xf32>
    %cst_13 = arith.constant 1.000000e+00 : f32
    %21 = vector.broadcast %cst_13 : f32 to vector<128x64xf32>
    %22 = arith.addf %21, %20 : vector<128x64xf32>
    %23 = tpu.reciprocal %22 {approx = true} : vector<128x64xf32> -> vector<128x64xf32>
    %24 = arith.truncf %23 : vector<128x64xf32> to vector<128x64xbf16>
    %c0_14 = arith.constant 0 : index
    %c0_15 = arith.constant 0 : index
    %25 = vector.load %arg6[%c0_14, %c0_15] : memref<64x128xbf16, #tpu.memory_space<vmem>>, vector<64x128xbf16>
    %cst_16 = arith.constant dense<0.000000e+00> : vector<128x128xf32>
    %26 = tpu.matmul %24, %25, %cst_16 {dimension_numbers = #tpu.dot_dimension_numbers<[1], [0], [0], [1], [0, 0, 1, 1], [], []>} : vector<128x64xbf16>, vector<64x128xbf16>, vector<128x128xf32> -> vector<128x128xf32>
    %c0_17 = arith.constant 0 : index
    %c0_18 = arith.constant 0 : index
    %27 = vector.load %arg7[%c0_17, %c0_18] : memref<1x128xf32, #tpu.memory_space<vmem>>, vector<1x128xf32>
    %28 = vector.broadcast %27 : vector<1x128xf32> to vector<128x128xf32>
    %29 = arith.addf %26, %28 : vector<128x128xf32>
    %cst_19 = arith.constant dense<0xFF800000> : vector<128xf32>
    %30 = vector.multi_reduction <maximumf>, %29, %cst_19 [1] : vector<128x128xf32> to vector<128xf32>
    %31 = vector.shape_cast %30 : vector<128xf32> to vector<128x1xf32>
    %32 = vector.broadcast %31 : vector<128x1xf32> to vector<128x128xf32>
    %33 = arith.subf %29, %32 : vector<128x128xf32>
    %34 = math.exp %33 : vector<128x128xf32>
    %cst_20 = arith.constant dense<0.000000e+00> : vector<128xf32>
    %35 = vector.multi_reduction <add>, %34, %cst_20 [1] : vector<128x128xf32> to vector<128xf32>
    %36 = vector.shape_cast %35 : vector<128xf32> to vector<128x1xf32>
    %37 = tpu.reciprocal %36 {approx = true} : vector<128x1xf32> -> vector<128x1xf32>
    %38 = vector.broadcast %37 : vector<128x1xf32> to vector<128x128xf32>
    %39 = arith.mulf %34, %38 : vector<128x128xf32>
    %c0_21 = arith.constant 0 : index
    %c0_22 = arith.constant 0 : index
    %40 = vector.load %arg8[%c0_21, %c0_22] : memref<128x128xf32, #tpu.memory_space<vmem>>, vector<128x128xf32>
    tpu.vector_store %arg8[%c0_21, %c0_22], %39 {strides = array<i32>} : memref<128x128xf32, #tpu.memory_space<vmem>>, vector<128x128xf32>,
    return
  }
  func.func @transform_0(%arg0: i32) -> (i32, i32) {
    %c0_i32 = arith.constant 0 : i32
    %c0_i32_0 = arith.constant 0 : i32
    return %arg0, %c0_i32 : i32, i32
  }
  func.func @transform_1(%arg0: i32) -> (i32, i32) {
    %c0_i32 = arith.constant 0 : i32
    %c0_i32_0 = arith.constant 0 : i32
    %c0_i32_1 = arith.constant 0 : i32
    return %c0_i32, %c0_i32_0 : i32, i32
  }
  func.func @transform_2(%arg0: i32) -> (i32, i32) {
    %c0_i32 = arith.constant 0 : i32
    %c0_i32_0 = arith.constant 0 : i32
    %c0_i32_1 = arith.constant 0 : i32
    return %c0_i32, %c0_i32_0 : i32, i32
  }
  func.func @transform_3(%arg0: i32) -> (i32, i32) {
    %c0_i32 = arith.constant 0 : i32
    %c0_i32_0 = arith.constant 0 : i32
    %c0_i32_1 = arith.constant 0 : i32
    return %c0_i32, %c0_i32_0 : i32, i32
  }
  func.func @transform_4(%arg0: i32) -> (i32, i32) {
    %c0_i32 = arith.constant 0 : i32
    %c0_i32_0 = arith.constant 0 : i32
    %c0_i32_1 = arith.constant 0 : i32
    return %c0_i32, %c0_i32_0 : i32, i32
  }
  func.func @transform_5(%arg0: i32) -> (i32, i32) {
    %c0_i32 = arith.constant 0 : i32
    %c0_i32_0 = arith.constant 0 : i32
    %c0_i32_1 = arith.constant 0 : i32
    return %c0_i32, %c0_i32_0 : i32, i32
  }
  func.func @transform_6(%arg0: i32) -> (i32, i32) {
    %c0_i32 = arith.constant 0 : i32
    %c0_i32_0 = arith.constant 0 : i32
    %c0_i32_1 = arith.constant 0 : i32
    return %c0_i32, %c0_i32_0 : i32, i32
  }
  func.func @transform_7(%arg0: i32) -> (i32, i32) {
    %c0_i32 = arith.constant 0 : i32
    %c0_i32_0 = arith.constant 0 : i32
    return %arg0, %c0_i32 : i32, i32
  }
}

</mosaic_0001>

<bundles_post_ra>
// kernel: tpu_custom_call.1
= control target key start
LH: loop header
LB: loop body
LE: loop exit
PB: predicated region body
PF: predicated region fallthrough
CT: control target
= control target key end

     0   :  { %12 = vsyncpa [#allocation3], 0  ;;  %s3189_s0 = inlined_call_operand.hbm [shape: bf16[128,896], index: 0, kind: input, shape index: {}]   ;;  %s3190_s1 = inlined_call_operand.hbm [shape: bf16[896,128], index: 1, kind: input, shape index: {}]   ;;  %s3191_s2 = inlined_call_operand.vmem [shape: f32[1,128], index: 2, kind: input, shape index: {}]   ;;  %s3192_s3 = inlined_call_operand.vmem [shape: bf16[128,64], index: 3, kind: input, shape index: {}]   ;;  %s3193_s4 = inlined_call_operand.vmem [shape: f32[1,64], index: 4, kind: input, shape index: {}]   ;;  %s3194_s5 = inlined_call_operand.vmem [shape: bf16[64,128], index: 5, kind: input, shape index: {}]   ;;  %s3195_s6 = inlined_call_operand.vmem [shape: f32[1,128], index: 6, kind: input, shape index: {}]   ;;  %s3196_s7 = inlined_call_operand.hbm [shape: f32[128,128], index: 7, kind: output, shape index: {}]  }
   0x1   :  { %13 = vsyncpa [#allocation6], 0 }
   0x2   :  { %14 = vsyncpa [#allocation4], 0  ;;  %s2816_s24 = smov [#allocation2]  }
   0x3   :  { %s20_s25 = sshll.u32 %s2816_s24, 4  ;;  %s21_s25 = int_to_ptr.vmem [resolvable:$true] %s20_s25 }
   0x4   :  { %s2758_s26 = scalar_lea.vmem %s21_s25, 7168  ;;  %p2763_p1 = scmp.lt.s32.totalorder %s21_s25, %s21_s25 }
   0x5   :  { %p2759_p0 = scmp.ne.s32.totalorder %s21_s25, %s2758_s26  ;;  %p2764_p2 = scmp.lt.s32.totalorder %s2758_s26, %s2758_s26 }
   0x7   :  { %p2765_p3 = por %p2764_p2, %p2763_p1 }
   0x9   :  { %p2766_p4 = pnand %p2765_p3, %p2759_p0 }
   0xb   :  { %2769 = shalt.err (!%p2766_p4)
}
   0xc   :  { %s2817_s27 = smov 448   ;;  %s2818_s28 = smov 28  }
   0xd   :  { %26 = dma.hbm_to_vmem [thread:$0]  %s3189_s0, 7168, %s21_s25, [#allocation3], %s2817_s27, %s2817_s27, %s2818_s28  }
   0xe   :  { %s2819_s8 = smov [#allocation5]  }
   0xf   :  { %s32_s9 = sshll.u32 %s2819_s8, 4  ;;  %s33_s9 = int_to_ptr.vmem [resolvable:$true] %s32_s9 }
  0x10   :  { %s2778_s10 = scalar_lea.vmem %s33_s9, 7168  ;;  %p2783_p6 = scmp.lt.s32.totalorder %s33_s9, %s33_s9 }
  0x11   :  { %p2779_p5 = scmp.ne.s32.totalorder %s33_s9, %s2778_s10  ;;  %p2784_p7 = scmp.lt.s32.totalorder %s2778_s10, %s2778_s10 }
  0x13   :  { %p2785_p8 = por %p2784_p7, %p2783_p6 }
  0x15   :  { %p2786_p9 = pnand %p2785_p8, %p2779_p5 }
  0x17   :  { %2789 = shalt.err (!%p2786_p9)
}
  0x18   :  { %s2820_s11 = smov 64   ;;  %s2821_s12 = smov 4  }
  0x19   :  { %38 = dma.hbm_to_vmem [thread:$0]  %s3190_s1, 7168, %s33_s9, [#allocation6], %s2820_s11, %s2820_s11, %s2821_s12  }
  0x1a   :  { %2810 = dma.done.wait [#allocation3], 7168  }
  0x1b   :  { %2811 = vsyncadd [#allocation3], 4294960128 }
  0x1c   :  { %2812 = dma.done.wait [#allocation6], 7168  }
  0x1d   :  { %2813 = vsyncadd [#allocation6], 4294960128  ;;  %v2410_v0 = vld [vmem:[#allocation5 + $0x78] sm:$0xff]   ;;  %v2414_v4 = vld [vmem:[#allocation5 + $0x70] sm:$0xff]   ;;  %vm1634_vm0 = vcmask 523264  }
  0x1e   :  { %v2411_v1 = vld [vmem:[#allocation5 + $0x38] sm:$0xff]   ;;  %2069 = vmatprep.subr.bf16.mxu0 %v2410_v0  ;;  %v2415_v5 = vld [vmem:[#allocation5 + $0x30] sm:$0xff]   ;;  %v2418_v8 = vld [vmem:[#allocation5 + $0x68] sm:$0xff]  }
  0x1f   :  { %v2412_v2 = vld [vmem:[#allocation5 + $0xf8] sm:$0xff]   ;;  %2070 = vmatpush3.bf16.msra.mxu0 %v2411_v1  ;;  %v2416_v6 = vld [vmem:[#allocation5 + $0xf0] sm:$0xff]   ;;  %v2419_v9 = vld [vmem:[#allocation5 + $0x28] sm:$0xff]  }
  0x20   :  { %v2413_v3 = vld [vmem:[#allocation5 + $0xb8] sm:$0xff]   ;;  %2133 = vmatprep.subr.bf16.mxu1 %v2412_v2  ;;  %2071 = vmatprep.subr.bf16.mxu0 %v2414_v4  ;;  %v2417_v7 = vld [vmem:[#allocation5 + $0xb0] sm:$0xff]   ;;  %v2420_v10 = vld [vmem:[#allocation5 + $0xe8] sm:$0xff]  }
  0x21   :  { %2134 = vmatpush3.bf16.msra.mxu1 %v2413_v3  ;;  %v2421_v11 = vld [vmem:[#allocation5 + $0xa8] sm:$0xff]   ;;  %v2422_v12 = vld [vmem:[#allocation5 + $0x60] sm:$0xff]   ;;  %v2426_v16 = vld [vmem:[#allocation5 + $0x58] sm:$0xff]  }
  0x22   :  { %2135 = vmatprep.subr.bf16.mxu1 %v2416_v6  ;;  %v2423_v13 = vld [vmem:[#allocation5 + $0x20] sm:$0xff]   ;;  %v2427_v17 = vld [vmem:[#allocation5 + $0x18] sm:$0xff]   ;;  %v2430_v20 = vld [vmem:[#allocation5 + $0x50] sm:$0xff]  }
  0x23   :  { %2072 = vmatpush3.bf16.msra.mxu0 %v2415_v5  ;;  %v2424_v14 = vld [vmem:[#allocation5 + $0xe0] sm:$0xff]   ;;  %v2428_v18 = vld [vmem:[#allocation5 + $0xd8] sm:$0xff]   ;;  %v2431_v21 = vld [vmem:[#allocation5 + $0x10] sm:$0xff]  }
  0x24   :  { %2073 = vmatprep.subr.bf16.mxu0 %v2418_v8  ;;  %v2425_v15 = vld [vmem:[#allocation5 + $0xa0] sm:$0xff]   ;;  %v2429_v19 = vld [vmem:[#allocation5 + $0x98] sm:$0xff]   ;;  %v2432_v22 = vld [vmem:[#allocation5 + $0xd0] sm:$0xff]  }
  0x25   :  { %2136 = vmatpush3.bf16.msra.mxu1 %v2417_v7  ;;  %v2433_v23 = vld [vmem:[#allocation5 + $0x90] sm:$0xff]   ;;  %v2434_v24 = vld [vmem:[#allocation5 + $0x48] sm:$0xff]   ;;  %v2438_v28 = vld [vmem:[#allocation5 + $0x40] sm:$0xff]  }
  0x26   :  { %2137 = vmatprep.subr.bf16.mxu1 %v2420_v10  ;;  %v2435_v25 = vld [vmem:[#allocation5 + $0x8] sm:$0xff]   ;;  %v2439_v29 = vld [vmem:[#allocation5] sm:$0xff]   ;;  %v2445_v34 = vld [vmem:[#allocation5 + $0x178] sm:$0xff]  }
  0x27   :  { %2074 = vmatpush3.bf16.msra.mxu0 %v2419_v9  ;;  %v2436_v26 = vld [vmem:[#allocation5 + $0xc8] sm:$0xff]   ;;  %v2440_v30 = vld [vmem:[#allocation5 + $0xc0] sm:$0xff]   ;;  %v2449_v37 = vld [vmem:[#allocation5 + $0x138] sm:$0xff]  }
  0x28   :  { %2075 = vmatprep.subr.bf16.mxu0 %v2422_v12  ;;  %v2437_v27 = vld [vmem:[#allocation5 + $0x88] sm:$0xff]   ;;  %v2441_v31 = vld [vmem:[#allocation2] ss:$28 sps:$4 sm:$0xff]   ;;  %v2452_v39 = vld [vmem:[#allocation2 + $0x38] ss:$28 sps:$4 sm:$0xff]  }
  0x29   :  { %2138 = vmatpush3.bf16.msra.mxu1 %v2421_v11  ;;  %v2443_v32 = vld [vmem:[#allocation2 + $0x4] ss:$28 sps:$4 sm:$0xff]   ;;  %v2448_v36 = vld [vmem:[#allocation2 + $0xc] ss:$28 sps:$4 sm:$0xff]   ;;  %v2450_v38 = vld [vmem:[#allocation2 + $0x3c] ss:$28 sps:$4 sm:$0xff]  }
  0x2a   :  { %2139 = vmatprep.subr.bf16.mxu1 %v2424_v14  ;;  %v2444_v33 = vld [vmem:[#allocation5 + $0x80] sm:$0xff]   ;;  %895 = vmatprep.mubr.bf16.mxu0 %v2443_v32  ;;  %v2453_v40 = vld [vmem:[#allocation5 + $0x170] sm:$0xff]   ;;  %v2461_v45 = vld [vmem:[#allocation5 + $0x168] sm:$0xff]  }
  0x2b   :  { %2076 = vmatpush3.bf16.msra.mxu0 %v2423_v13  ;;  %v2446_v35 = vld [vmem:[#allocation2 + $0x8] ss:$28 sps:$4 sm:$0xff]   ;;  %992 = vmatprep.mubr.bf16.mxu1 %v2448_v36  ;;  %v2456_v42 = vld [vmem:[#allocation5 + $0x130] sm:$0xff]   ;;  %v2457_v43 = vld [vmem:[#allocation2 + $0x40] ss:$28 sps:$4 sm:$0xff]  }
  0x2c   :  { %2077 = vmatprep.subr.bf16.mxu0 %v2426_v16  ;;  %v2454_v41 = vld [vmem:[#allocation2 + $0x44] ss:$28 sps:$4 sm:$0xff]   ;;  %v2458_v44 = vld [vmem:[#allocation2 + $0x74] ss:$28 sps:$4 sm:$0xff]   ;;  %v2462_v46 = vld [vmem:[#allocation2 + $0x7c] ss:$28 sps:$4 sm:$0xff]  }
  0x2d   :  { %2140 = vmatpush3.bf16.msra.mxu1 %v2425_v15  ;;  %v2464_v47 = vld [vmem:[#allocation5 + $0x128] sm:$0xff]   ;;  %v2469_v50 = vld [vmem:[#allocation5 + $0x160] sm:$0xff]   ;;  %v2465_v51 = vld [vmem:[#allocation2 + $0x78] ss:$28 sps:$4 sm:$0xff]  }
  0x2e   :  { %2141 = vmatprep.subr.bf16.mxu1 %v2428_v18  ;;  %v2460_v48 = vld [vmem:[#allocation2 + $0x70] ss:$28 sps:$4 sm:$0xff]   ;;  %v2472_v52 = vld [vmem:[#allocation5 + $0x120] sm:$0xff]   ;;  %v2477_v54 = vld [vmem:[#allocation5 + $0x158] sm:$0xff]  }
  0x2f   :  { %2078 = vmatpush3.bf16.msra.mxu0 %v2427_v17  ;;  %v2466_v49 = vld [vmem:[#allocation2 + $0xac] ss:$28 sps:$4 sm:$0xff]   ;;  %v2470_v53 = vld [vmem:[#allocation2 + $0xb4] ss:$28 sps:$4 sm:$0xff]   ;;  %v2480_v56 = vld [vmem:[#allocation5 + $0x118] sm:$0xff]  }
  0x30   :  { %2079 = vmatprep.subr.bf16.mxu0 %v2430_v20  ;;  %v2468_v55 = vld [vmem:[#allocation2 + $0xa8] ss:$28 sps:$4 sm:$0xff]   ;;  %v2482_v58 = vld [vmem:[#allocation5 + $0x1b8] sm:$0xff]   ;;  %v2473_v59 = vld [vmem:[#allocation2 + $0xb0] ss:$28 sps:$4 sm:$0xff]  }
  0x31   :  { %2142 = vmatpush3.bf16.msra.mxu1 %v2429_v19  ;;  %v2474_v57 = vld [vmem:[#allocation2 + $0xe4] ss:$28 sps:$4 sm:$0xff]   ;;  %v2478_v60 = vld [vmem:[#allocation2 + $0xec] ss:$28 sps:$4 sm:$0xff]   ;;  %v2486_v61 = vld [vmem:[#allocation5 + $0x150] sm:$0xff]  }
  0x32   :  { %2143 = vmatprep.subr.bf16.mxu1 %v2432_v22  ;;  %v2487_v62 = vld [vmem:[#allocation5 + $0x1b0] sm:$0xff]   ;;  %v2492_v0 = vld [vmem:[#allocation5 + $0x1a8] sm:$0xff]   ;;  %v2476_v1 = vld [vmem:[#allocation2 + $0xe0] ss:$28 sps:$4 sm:$0xff]  }
  0x33   :  { %2080 = vmatpush3.bf16.msra.mxu0 %v2431_v21  ;;  %v2490_v63 = vld [vmem:[#allocation5 + $0x110] sm:$0xff]   ;;  %v2481_v2 = vld [vmem:[#allocation2 + $0xe8] ss:$28 sps:$4 sm:$0xff]   ;;  %v2483_v3 = vld [vmem:[#allocation2 + $0x11c] ss:$28 sps:$4 sm:$0xff]  }
  0x34   :  { %2081 = vmatprep.subr.bf16.mxu0 %v2434_v24  ;;  %v2496_v4 = vld [vmem:[#allocation5 + $0x148] sm:$0xff]   ;;  %v2497_v5 = vld [vmem:[#allocation5 + $0x1a0] sm:$0xff]   ;;  %v2502_v8 = vld [vmem:[#allocation5 + $0x198] sm:$0xff]  }
  0x35   :  { %2144 = vmatpush3.bf16.msra.mxu1 %v2433_v23  ;;  %v2488_v6 = vld [vmem:[#allocation2 + $0x124] ss:$28 sps:$4 sm:$0xff]   ;;  %v2500_v7 = vld [vmem:[#allocation5 + $0x108] sm:$0xff]   ;;  %v2485_v9 = vld [vmem:[#allocation2 + $0x118] ss:$28 sps:$4 sm:$0xff]  }
  0x36   :  { %2145 = vmatprep.subr.bf16.mxu1 %v2436_v26  ;;  %v2506_v10 = vld [vmem:[#allocation5 + $0x140] sm:$0xff]   ;;  %v2493_v12 = vld [vmem:[#allocation2 + $0x154] ss:$28 sps:$4 sm:$0xff]   ;;  %v2498_v15 = vld [vmem:[#allocation2 + $0x15c] ss:$28 sps:$4 sm:$0xff]  }
  0x37   :  { %2082 = vmatpush3.bf16.msra.mxu0 %v2435_v25  ;;  %v2491_v11 = vld [vmem:[#allocation2 + $0x120] ss:$28 sps:$4 sm:$0xff]   ;;  %v2507_v13 = vld [vmem:[#allocation5 + $0x190] sm:$0xff]   ;;  %v2512_v16 = vld [vmem:[#allocation5 + $0x188] sm:$0xff]  }
  0x38   :  { %2083 = vmatprep.subr.bf16.mxu0 %v2438_v28  ;;  %v2510_v14 = vld [vmem:[#allocation5 + $0x100] sm:$0xff]   ;;  %v2495_v17 = vld [vmem:[#allocation2 + $0x150] ss:$28 sps:$4 sm:$0xff]   ;;  %v2501_v20 = vld [vmem:[#allocation2 + $0x158] ss:$28 sps:$4 sm:$0xff]  }
  0x39   :  { %2146 = vmatpush3.bf16.msra.mxu1 %v2437_v27  ;;  %v2503_v18 = vld [vmem:[#allocation2 + $0x18c] ss:$28 sps:$4 sm:$0xff]   ;;  %v2516_v19 = vld [vmem:[#allocation5 + $0x180] sm:$0xff]   ;;  %v2508_v21 = vld [vmem:[#allocation2 + $0x194] ss:$28 sps:$4 sm:$0xff]  }
  0x3a   :  { %2147 = vmatprep.subr.bf16.mxu1 %v2440_v30  ;;  %v2505_v22 = vld [vmem:[#allocation2 + $0x188] ss:$28 sps:$4 sm:$0xff]   ;;  %v2515_v23 = vld [vmem:[#allocation2 + $0x14] ss:$28 sps:$4 sm:$0xff]   ;;  %v2526_v32 = vld [vmem:[#allocation2 + $0xc0] ss:$28 sps:$4 sm:$0xff]  }
  0x3b   :  { %2084 = vmatpush3.bf16.msra.mxu0 %v2439_v29  ;;  %v2511_v24 = vld [vmem:[#allocation2 + $0x190] ss:$28 sps:$4 sm:$0xff]   ;;  %v2517_v25 = vld [vmem:[#allocation2 + $0x18] ss:$28 sps:$4 sm:$0xff]   ;;  %v2525_v29 = vld [vmem:[#allocation2 + $0x88] ss:$28 sps:$4 sm:$0xff]  }
  0x3c   :  { %2197 = vmatprep.subr.bf16.mxu0 %v2445_v34  ;;  %v2513_v26 = vld [vmem:[#allocation2 + $0x10] ss:$28 sps:$4 sm:$0xff]   ;;  %v2521_v30 = vld [vmem:[#allocation2 + $0x48] ss:$28 sps:$4 sm:$0xff]   ;;  %v2524_v34 = vld [vmem:[#allocation2 + $0x80] ss:$28 sps:$4 sm:$0xff]  }
  0x3d   :  { %2148 = vmatpush3.bf16.msra.mxu1 %v2444_v33  ;;  %v2519_v27 = vld [vmem:[#allocation2 + $0x4c] ss:$28 sps:$4 sm:$0xff]   ;;  %v2533_v33 = vld [vmem:[#allocation2 + $0xf8] ss:$28 sps:$4 sm:$0xff]  }
  0x3e   :  { %896 = vmatmul.mubr.bf16.vlgmr.msra.gmra.mxu0 %v2441_v31  ;;  %2305 = vmatprep.subr.bf16.mxu1 %v2482_v58  ;;  %v2518_v28 = vld [vmem:[#allocation2 + $0x50] ss:$28 sps:$4 sm:$0xff]   ;;  %v2522_v31 = vld [vmem:[#allocation2 + $0x84] ss:$28 sps:$4 sm:$0xff]  }
  0x3f   :  { %2198 = vmatpush3.bf16.msra.mxu0 %v2449_v37  ;;  %903 = vmatprep.mubr.bf16.mxu0 %v2450_v38  ;;  %v2534_v36 = vld [vmem:[#allocation2 + $0x130] ss:$28 sps:$4 sm:$0xff]   ;;  %v2541_v37 = vld [vmem:[#allocation2 + $0x168] ss:$28 sps:$4 sm:$0xff]   ;;  %v2529_v38 = vld [vmem:[#allocation2 + $0xb8] ss:$28 sps:$4 sm:$0xff]  }
  0x40   :  { %993 = vmatmul.mubr.bf16.vlgmr.msra.gmra.mxu1 %v2446_v35  ;;  %2199 = vmatprep.subr.bf16.mxu0 %v2453_v40  ;;  %v2527_v35 = vld [vmem:[#allocation2 + $0xbc] ss:$28 sps:$4 sm:$0xff]  }
  0x41   :  { %1000 = vmatprep.mubr.bf16.mxu1 %v2454_v41  ;;  %2306 = vmatpush3.bf16.msra.mxu1 %v2482_v58  ;;  %v2542_v40 = vld [vmem:[#allocation2 + $0x1a0] ss:$28 sps:$4 sm:$0xff]   ;;  %v2532_v41 = vld [vmem:[#allocation2 + $0xf0] ss:$28 sps:$4 sm:$0xff]  }
  0x42   :  { %2307 = vmatprep.subr.bf16.mxu1 %v2487_v62 }
  0x43   :  { %2200 = vmatpush3.bf16.msra.mxu0 %v2456_v42  ;;  %v2535_v42 = vld [vmem:[#allocation2 + $0x12c] ss:$28 sps:$4 sm:$0xff]  }
  0x44   :  { %2201 = vmatprep.subr.bf16.mxu0 %v2461_v45  ;;  %v2540_v45 = vld [vmem:[#allocation2 + $0x160] ss:$28 sps:$4 sm:$0xff]  }
  0x45   :  { %2308 = vmatpush3.bf16.msra.mxu1 %v2487_v62 }
  0x46   :  { %904 = vmatmul.mubr.bf16.gmra.mxu0 %v2452_v39  ;;  %2309 = vmatprep.subr.bf16.mxu1 %v2492_v0  ;;  %v2530_v39 = vld [vmem:[#allocation2 + $0xf4] ss:$28 sps:$4 sm:$0xff]  }
  0x47   :  { %911 = vmatprep.mubr.bf16.mxu0 %v2458_v44  ;;  %2202 = vmatpush3.bf16.msra.mxu0 %v2464_v47  ;;  %v2538_v44 = vld [vmem:[#allocation2 + $0x164] ss:$28 sps:$4 sm:$0xff]   ;;  %v2545_v47 = vld [vmem:[#allocation2 + $0x198] ss:$28 sps:$4 sm:$0xff]  }
  0x48   :  { %1001 = vmatmul.mubr.bf16.gmra.mxu1 %v2457_v43  ;;  %2203 = vmatprep.subr.bf16.mxu0 %v2469_v50  ;;  %v2537_v43 = vld [vmem:[#allocation2 + $0x128] ss:$28 sps:$4 sm:$0xff]  }
  0x49   :  { %1008 = vmatprep.mubr.bf16.mxu1 %v2462_v46  ;;  %2310 = vmatpush3.bf16.msra.mxu1 %v2492_v0  ;;  %v2543_v46 = vld [vmem:[#allocation2 + $0x19c] ss:$28 sps:$4 sm:$0xff]   ;;  %v2548_v50 = vld [vmem:[%s3192_s3 + $0x28] sm:$0xff]  }
  0x4a   :  { %2311 = vmatprep.subr.bf16.mxu1 %v2497_v5 }
  0x4b   :  { %2204 = vmatpush3.bf16.msra.mxu0 %v2472_v52  ;;  %v2550_v52 = vld [vmem:[%s3192_s3 + $0x18] sm:$0xff]  }
  0x4c   :  { %2205 = vmatprep.subr.bf16.mxu0 %v2477_v54  ;;  %v2552_v54 = vld [vmem:[%s3192_s3 + $0x8] sm:$0xff]  }
  0x4d   :  { %2312 = vmatpush3.bf16.msra.mxu1 %v2497_v5 }
  0x4e   :  { %912 = vmatmul.mubr.bf16.gmra.mxu0 %v2460_v48  ;;  %2313 = vmatprep.subr.bf16.mxu1 %v2502_v8  ;;  %v2546_v48 = vld [vmem:[%s3192_s3 + $0x38] sm:$0xff]  }
  0x4f   :  { %919 = vmatprep.mubr.bf16.mxu0 %v2466_v49  ;;  %2206 = vmatpush3.bf16.msra.mxu0 %v2480_v56  ;;  %v2547_v49 = vld [vmem:[%s3192_s3 + $0x30] sm:$0xff]  }
  0x50   :  { %1009 = vmatmul.mubr.bf16.gmra.mxu1 %v2465_v51  ;;  %2207 = vmatprep.subr.bf16.mxu0 %v2486_v61  ;;  %v2549_v51 = vld [vmem:[%s3192_s3 + $0x20] sm:$0xff]  }
  0x51   :  { %1016 = vmatprep.mubr.bf16.mxu1 %v2470_v53  ;;  %2314 = vmatpush3.bf16.msra.mxu1 %v2502_v8  ;;  %v2551_v53 = vld [vmem:[%s3192_s3 + $0x10] sm:$0xff]  }
  0x52   :  { %2315 = vmatprep.subr.bf16.mxu1 %v2507_v13 }
  0x53   :  { %2208 = vmatpush3.bf16.msra.mxu0 %v2490_v63 }
  0x54   :  { %2209 = vmatprep.subr.bf16.mxu0 %v2496_v4 }
  0x55   :  { %2316 = vmatpush3.bf16.msra.mxu1 %v2507_v13 }
  0x56   :  { %920 = vmatmul.mubr.bf16.gmra.mxu0 %v2468_v55  ;;  %2317 = vmatprep.subr.bf16.mxu1 %v2512_v16  ;;  %v2553_v55 = vld [vmem:[%s3192_s3] sm:$0xff]  }
  0x57   :  { %927 = vmatprep.mubr.bf16.mxu0 %v2474_v57  ;;  %2210 = vmatpush3.bf16.msra.mxu0 %v2500_v7  ;;  %v2898_v57 = vld [vmem:[%s3191_s2] ss:$0 sm:$0xff] }
  0x58   :  { %1017 = vmatmul.mubr.bf16.gmra.mxu1 %v2473_v59  ;;  %2211 = vmatprep.subr.bf16.mxu0 %v2506_v10 }
  0x59   :  { %1024 = vmatprep.mubr.bf16.mxu1 %v2478_v60  ;;  %2318 = vmatpush3.bf16.msra.mxu1 %v2512_v16 }
  0x5a   :  { %2319 = vmatprep.subr.bf16.mxu1 %v2516_v19 }
  0x5b   :  { %2212 = vmatpush3.bf16.msra.mxu0 %v2510_v14 }
  0x5d   :  { %2320 = vmatpush3.bf16.msra.mxu1 %v2516_v19 }
  0x5e   :  { %928 = vmatmul.mubr.bf16.gmra.mxu0 %v2476_v1  ;;  %2337 = vmatprep.subr.bf16.mxu1 %v2546_v48 }
  0x5f   :  { %935 = vmatprep.mubr.bf16.mxu0 %v2483_v3 }
  0x60   :  { %1025 = vmatmul.mubr.bf16.gmra.mxu1 %v2481_v2 }
  0x61   :  { %1032 = vmatprep.mubr.bf16.mxu1 %v2488_v6 }
  0x66   :  { %936 = vmatmul.mubr.bf16.gmra.mxu0 %v2485_v9 }
  0x67   :  { %943 = vmatprep.mubr.bf16.mxu0 %v2493_v12 }
  0x68   :  { %1033 = vmatmul.mubr.bf16.gmra.mxu1 %v2491_v11 }
  0x69   :  { %1040 = vmatprep.mubr.bf16.mxu1 %v2498_v15 }
  0x6e   :  { %944 = vmatmul.mubr.bf16.gmra.mxu0 %v2495_v17 }
  0x6f   :  { %951 = vmatprep.mubr.bf16.mxu0 %v2503_v18 }
  0x70   :  { %1041 = vmatmul.mubr.bf16.gmra.mxu1 %v2501_v20 }
  0x71   :  { %1048 = vmatprep.mubr.bf16.mxu1 %v2508_v21 }
  0x76   :  { %952 = vmatmul.mubr.bf16.gmra.mxu0 %v2505_v22 }
  0x77   :  { %1089 = vmatprep.mubr.bf16.mxu0 %v2515_v23 }
  0x78   :  { %1049 = vmatmul.mubr.bf16.gmra.mxu1 %v2511_v24 }
  0x79   :  { %2321 = vmatprep.mubr.bf16.mxu1 %v2517_v25 }
  0x7e   :  { %1090 = vmatmul.mubr.bf16.vlgmr.msra.gmra.mxu0 %v2513_v26 }
  0x7f   :  { %1097 = vmatprep.mubr.bf16.mxu0 %v2519_v27 }
  0x80   :  { %2322 = vmatmul.mubr.bf16.vlgmr.msra.gmra.mxu1 %v2518_v28 }
  0x81   :  { %2325 = vmatprep.mubr.bf16.mxu1 %v2525_v29  ;;  %2338 = vmatpush3.bf16.msra.mxu1 %v2546_v48 }
  0x82   :  { %2339 = vmatprep.subr.bf16.mxu1 %v2547_v49 }
  0x85   :  { %2340 = vmatpush3.bf16.msra.mxu1 %v2547_v49 }
  0x86   :  { %1098 = vmatmul.mubr.bf16.gmra.mxu0 %v2521_v30  ;;  %2341 = vmatprep.subr.bf16.mxu1 %v2548_v50 }
  0x87   :  { %1105 = vmatprep.mubr.bf16.mxu0 %v2522_v31 }
  0x88   :  { %2326 = vmatmul.mubr.bf16.gmra.mxu1 %v2526_v32 }
  0x89   :  { %2329 = vmatprep.mubr.bf16.mxu1 %v2533_v33  ;;  %2342 = vmatpush3.bf16.msra.mxu1 %v2548_v50 }
  0x8a   :  { %2343 = vmatprep.subr.bf16.mxu1 %v2549_v51 }
  0x8d   :  { %2344 = vmatpush3.bf16.msra.mxu1 %v2549_v51 }
  0x8e   :  { %1106 = vmatmul.mubr.bf16.gmra.mxu0 %v2524_v34  ;;  %2345 = vmatprep.subr.bf16.mxu1 %v2550_v52 }
  0x8f   :  { %1113 = vmatprep.mubr.bf16.mxu0 %v2527_v35 }
  0x90   :  { %2330 = vmatmul.mubr.bf16.gmra.mxu1 %v2534_v36 }
  0x91   :  { %2333 = vmatprep.mubr.bf16.mxu1 %v2541_v37  ;;  %2346 = vmatpush3.bf16.msra.mxu1 %v2550_v52 }
  0x92   :  { %2347 = vmatprep.subr.bf16.mxu1 %v2551_v53 }
  0x95   :  { %2348 = vmatpush3.bf16.msra.mxu1 %v2551_v53 }
  0x96   :  { %1114 = vmatmul.mubr.bf16.gmra.mxu0 %v2529_v38  ;;  %2349 = vmatprep.subr.bf16.mxu1 %v2552_v54 }
  0x97   :  { %1121 = vmatprep.mubr.bf16.mxu0 %v2530_v39 }
  0x98   :  { %2334 = vmatmul.mubr.bf16.gmra.mxu1 %v2542_v40 }
  0x99   :  { %2350 = vmatpush3.bf16.msra.mxu1 %v2552_v54 }
  0x9a   :  { %2351 = vmatprep.subr.bf16.mxu1 %v2553_v55 }
  0x9d   :  { %2352 = vmatpush3.bf16.msra.mxu1 %v2553_v55 }
  0x9e   :  { %1122 = vmatmul.mubr.bf16.gmra.mxu0 %v2532_v41 }
  0x9f   :  { %1129 = vmatprep.mubr.bf16.mxu0 %v2535_v42 }
  0xa6   :  { %1130 = vmatmul.mubr.bf16.gmra.mxu0 %v2537_v43 }
  0xa7   :  { %1137 = vmatprep.mubr.bf16.mxu0 %v2538_v44 }
  0xae   :  { %1138 = vmatmul.mubr.bf16.gmra.mxu0 %v2540_v45 }
  0xaf   :  { %1145 = vmatprep.mubr.bf16.mxu0 %v2543_v46 }
  0xb6   :  { %1146 = vmatmul.mubr.bf16.gmra.mxu0 %v2545_v47 }
  0xfe   :  { %v2085_v56 = vpop.f32.mrf.mxu0 }
 0x100   :  { %v2086_v58 = vpop.f32.mrf.mxu0  ;;  %v2149_v60 = vpop.f32.mrf.mxu1 }
 0x101   :  { %v2087_v59 = vadd.f32 %v2086_v58, %v2085_v56 }
 0x102   :  { %v2900_v61 = vpop.f32.mrf.mxu0  ;;  %v2150_v63 = vpop.f32.mrf.mxu1 }
 0x103   :  { %v898_v62 = vadd.f32 %v2087_v59, %v2898_v57  ;;  %v2151_v0 = vadd.f32 %v2150_v63, %v2149_v60 }
 0x104   :  { %v2903_v1 = vpop.f32.mrf.mxu0  ;;  %v2905_v2 = vpop.f32.mrf.mxu1 }
 0x105   :  { %v2907_v3 = vadd.f32 %v2151_v0, %v898_v62 }
 0x106   :  { %v2091_v4 = vpop.f32.mrf.mxu0  ;;  %v2909_v5 = vpop.f32.mrf.mxu1 }
 0x108   :  { %v2092_v6 = vpop.f32.mrf.mxu0  ;;  %v2155_v8 = vpop.f32.mrf.mxu1 }
 0x109   :  { %v2093_v7 = vadd.f32 %v2092_v6, %v2091_v4 }
 0x10a   :  { %v2911_v9 = vpop.f32.mrf.mxu0  ;;  %v2156_v11 = vpop.f32.mrf.mxu1 }
 0x10b   :  { %v906_v10 = vadd.f32 %v2093_v7, %v2898_v57  ;;  %v2157_v12 = vadd.f32 %v2156_v11, %v2155_v8 }
 0x10c   :  { %v2914_v13 = vpop.f32.mrf.mxu0  ;;  %v2916_v14 = vpop.f32.mrf.mxu1 }
 0x10d   :  { %v2918_v15 = vadd.f32 %v2157_v12, %v906_v10 }
 0x10e   :  { %v2097_v16 = vpop.f32.mrf.mxu0  ;;  %v2920_v17 = vpop.f32.mrf.mxu1 }
 0x110   :  { %v2098_v18 = vpop.f32.mrf.mxu0  ;;  %v2161_v20 = vpop.f32.mrf.mxu1 }
 0x111   :  { %v2099_v19 = vadd.f32 %v2098_v18, %v2097_v16 }
 0x112   :  { %v2922_v21 = vpop.f32.mrf.mxu0  ;;  %v2162_v23 = vpop.f32.mrf.mxu1 }
 0x113   :  { %v914_v22 = vadd.f32 %v2099_v19, %v2898_v57  ;;  %v2163_v24 = vadd.f32 %v2162_v23, %v2161_v20 }
 0x114   :  { %v2925_v25 = vpop.f32.mrf.mxu0  ;;  %v2927_v26 = vpop.f32.mrf.mxu1 }
 0x115   :  { %v2929_v27 = vadd.f32 %v2163_v24, %v914_v22 }
 0x116   :  { %v2103_v28 = vpop.f32.mrf.mxu0  ;;  %v2931_v29 = vpop.f32.mrf.mxu1 }
 0x118   :  { %v2104_v30 = vpop.f32.mrf.mxu0  ;;  %v2167_v32 = vpop.f32.mrf.mxu1 }
 0x119   :  { %v2105_v31 = vadd.f32 %v2104_v30, %v2103_v28 }
 0x11a   :  { %v2933_v33 = vpop.f32.mrf.mxu0  ;;  %v2168_v35 = vpop.f32.mrf.mxu1 }
 0x11b   :  { %v922_v34 = vadd.f32 %v2105_v31, %v2898_v57  ;;  %v2169_v36 = vadd.f32 %v2168_v35, %v2167_v32 }
 0x11c   :  { %v2936_v37 = vpop.f32.mrf.mxu0  ;;  %v2938_v38 = vpop.f32.mrf.mxu1 }
 0x11d   :  { %v2940_v39 = vadd.f32 %v2169_v36, %v922_v34 }
 0x11e   :  { %v2109_v40 = vpop.f32.mrf.mxu0  ;;  %v2942_v41 = vpop.f32.mrf.mxu1 }
 0x120   :  { %v2110_v42 = vpop.f32.mrf.mxu0  ;;  %v2173_v44 = vpop.f32.mrf.mxu1 }
 0x121   :  { %v2111_v43 = vadd.f32 %v2110_v42, %v2109_v40 }
 0x122   :  { %v2944_v45 = vpop.f32.mrf.mxu0  ;;  %v2174_v47 = vpop.f32.mrf.mxu1 }
 0x123   :  { %v930_v46 = vadd.f32 %v2111_v43, %v2898_v57  ;;  %v2175_v48 = vadd.f32 %v2174_v47, %v2173_v44  ;;  %v2090_v43 = vadd.f32 %v2903_v1, %v2900_v61  ;;  %v2096_v61 = vadd.f32 %v2914_v13, %v2911_v9 }
 0x124   :  { %v2947_v49 = vpop.f32.mrf.mxu0  ;;  %v2949_v50 = vpop.f32.mrf.mxu1 }
 0x125   :  { %v2951_v51 = vadd.f32 %v2175_v48, %v930_v46 }
 0x126   :  { %v2115_v52 = vpop.f32.mrf.mxu0  ;;  %v2953_v53 = vpop.f32.mrf.mxu1 }
 0x128   :  { %v2116_v54 = vpop.f32.mrf.mxu0  ;;  %v2179_v56 = vpop.f32.mrf.mxu1 }
 0x129   :  { %v2117_v55 = vadd.f32 %v2116_v54, %v2115_v52  ;;  %v901_v54 = vadd.f32 %v2090_v43, %v2898_v57  ;;  %v2102_v43 = vadd.f32 %v2925_v25, %v2922_v21 }
 0x12a   :  { %v2955_v58 = vpop.f32.mrf.mxu0  ;;  %v2180_v60 = vpop.f32.mrf.mxu1 }
 0x12b   :  { %v938_v59 = vadd.f32 %v2117_v55, %v2898_v57  ;;  %v2181_v62 = vadd.f32 %v2180_v60, %v2179_v56  ;;  %v2154_v55 = vadd.f32 %v2909_v5, %v2905_v2  ;;  %v909_v2 = vadd.f32 %v2096_v61, %v2898_v57 }
 0x12c   :  { %v2958_v63 = vpop.f32.mrf.mxu0  ;;  %v2960_v0 = vpop.f32.mrf.mxu1 }
 0x12d   :  { %v2962_v4 = vadd.f32 %v2181_v62, %v938_v59 }
 0x12e   :  { %v2121_v6 = vpop.f32.mrf.mxu0  ;;  %v2964_v7 = vpop.f32.mrf.mxu1 }
 0x130   :  { %v2122_v8 = vpop.f32.mrf.mxu0  ;;  %v2185_v11 = vpop.f32.mrf.mxu1 }
 0x131   :  { %v2123_v10 = vadd.f32 %v2122_v8, %v2121_v6  ;;  %v998_v8 = vadd.f32 %v2154_v55, %v901_v54 }
 0x132   :  { %v2966_v12 = vpop.f32.mrf.mxu0  ;;  %v2186_v18 = vpop.f32.mrf.mxu1 }
 0x133   :  { %v946_v16 = vadd.f32 %v2123_v10, %v2898_v57  ;;  %v2187_v19 = vadd.f32 %v2186_v18, %v2185_v11 }
 0x134   :  { %v2969_v20 = vpop.f32.mrf.mxu0  ;;  %v2971_v22 = vpop.f32.mrf.mxu1 }
 0x135   :  { %v2973_v23 = vadd.f32 %v2187_v19, %v946_v16 }
 0x136   :  { %v2127_v24 = vpop.f32.mrf.mxu0  ;;  %v2975_v28 = vpop.f32.mrf.mxu1 }
 0x138   :  { %v2128_v30 = vpop.f32.mrf.mxu0  ;;  %v2191_v32 = vpop.f32.mrf.mxu1 }
 0x139   :  { %v2129_v31 = vadd.f32 %v2128_v30, %v2127_v24 }
 0x13a   :  { %v2977_v34 = vpop.f32.mrf.mxu0  ;;  %v2192_v36 = vpop.f32.mrf.mxu1 }
 0x13b   :  { %v954_v35 = vadd.f32 %v2129_v31, %v2898_v57  ;;  %v2193_v40 = vadd.f32 %v2192_v36, %v2191_v32  ;;  %v2160_v31 = vadd.f32 %v2920_v17, %v2916_v14 }
 0x13c   :  { %v2980_v42 = vpop.f32.mrf.mxu0  ;;  %v2984_v44 = vpop.f32.mrf.mxu1 }
 0x13d   :  { %v2986_v46 = vadd.f32 %v2193_v40, %v954_v35 }
 0x13e   :  { %v2213_v47 = vpop.f32.mrf.mxu0  ;;  %v2988_v48 = vpop.f32.mrf.mxu1 }
 0x140   :  { %v2214_v52 = vpop.f32.mrf.mxu0  ;;  %v2323_v59 = vpop.f32.mrf.mxu1 }
 0x141   :  { %v2215_v56 = vadd.f32 %v2214_v52, %v2213_v47  ;;  %v1006_v52 = vadd.f32 %v2160_v31, %v909_v2 }
 0x142   :  { %v2216_v60 = vpop.f32.mrf.mxu0  ;;  %v1188_v6 = vpop.f32.mrf.mxu1 }
 0x143   :  { %v1092_v62 = vadd.f32 %v2215_v56, %v2907_v3 }
 0x144   :  { %v2217_v1 = vpop.f32.mrf.mxu0  ;;  %v2324_v16 = vpop.f32.mrf.mxu1 }
 0x145   :  { %v2218_v10 = vadd.f32 %v2217_v1, %v2216_v60  ;;  %v1189_v11 = vadd.f32 %v1188_v6, %v1092_v62  ;;  %v917_v6 = vadd.f32 %v2102_v43, %v2898_v57 }
 0x146   :  { %v2219_v18 = vpop.f32.mrf.mxu0  ;;  %v1191_v30 = vpop.f32.mrf.mxu1 }
 0x147   :  { %v1251_v19 = vsub.f32 0.0, %v1189_v11  ;;  %v1095_v24 = vadd.f32 %v2218_v10, %v998_v8 }
 0x148   :  { %v2220_v5 = vpop.f32.mrf.mxu0  ;;  %v2327_v9 = vpop.f32.mrf.mxu1 }
 0x149   :  { %v1267_v3 = vmul.f32 1.442695, %v1251_v19  ;;  %v2221_v32 = vadd.f32 %v2220_v5, %v2219_v18  ;;  %v1192_v35 = vadd.f32 %v1191_v30, %v1095_v24  ;;  %v2108_v18 = vadd.f32 %v2936_v37, %v2933_v33 }
 0x14a   :  { %v2222_v36 = vpop.f32.mrf.mxu0  ;;  %v1204_v62 = vpop.f32.mrf.mxu1 }
 0x14b   :  { %2558 = vpow2.f32 %v1267_v3  ;;  %v1100_v13 = vadd.f32 %v2221_v32, %v2918_v15  ;;  %v1252_v40 = vsub.f32 0.0, %v1192_v35  ;;  %v2166_v15 = vadd.f32 %v2931_v29, %v2927_v26 }
 0x14c   :  { %v2223_v47 = vpop.f32.mrf.mxu0  ;;  %v2328_v25 = vpop.f32.mrf.mxu1  ;;  %v925_v32 = vadd.f32 %v2108_v18, %v2898_v57  ;;  %v2172_v35 = vadd.f32 %v2942_v41, %v2938_v38 }
 0x14d   :  { %v1197_v54 = vadd.f32 %v2323_v59, %v1100_v13  ;;  %v1269_v55 = vmul.f32 1.442695, %v1252_v40  ;;  %v2224_v56 = vadd.f32 %v2223_v47, %v2222_v36  ;;  %v1014_v24 = vadd.f32 %v2166_v15, %v917_v6 }
 0x14e   :  { %v2225_v60 = vpop.f32.mrf.mxu0  ;;  %v1207_v3 = vpop.f32.mrf.mxu1 }
 0x14f   :  { %v1253_v14 = vsub.f32 0.0, %v1197_v54  ;;  %2560 = vpow2.f32 %v1269_v55  ;;  %v1103_v17 = vadd.f32 %v2224_v56, %v1006_v52  ;;  %v1022_v55 = vadd.f32 %v2172_v35, %v925_v32 }
 0x150   :  { %v2226_v61 = vpop.f32.mrf.mxu0  ;;  %v3011_v43 = vpop.f32.mrf.mxu1  ;;  %v2114_v56 = vadd.f32 %v2947_v49, %v2944_v45 }
 0x151   :  { %v1271_v1 = vmul.f32 1.442695, %v1253_v14  ;;  %v1200_v8 = vadd.f32 %v2324_v16, %v1103_v17  ;;  %v2227_v10 = vadd.f32 %v2226_v61, %v2225_v60 }
 0x152   :  { %v2228_v21 = vpop.f32.mrf.mxu0  ;;  %v1220_v6 = vpop.f32.mrf.mxu1 }
 0x153   :  { %2562 = vpow2.f32 %v1271_v1  ;;  %v1254_v59 = vsub.f32 0.0, %v1200_v8  ;;  %v1108_v11 = vadd.f32 %v2227_v10, %v2929_v27  ;;  %v2178_v8 = vadd.f32 %v2953_v53, %v2949_v50 }
 0x154   :  { %v2229_v19 = vpop.f32.mrf.mxu0 }
 0x155   :  { %v1273_v30 = vmul.f32 1.442695, %v1254_v59  ;;  %v2230_v2 = vadd.f32 %v2229_v19, %v2228_v21  ;;  %v1205_v5 = vadd.f32 %v1204_v62, %v1108_v11  ;;  %v2332_v11 = vpop.f32.mrf.mxu1 }
 0x156   :  { %v2231_v31 = vpop.f32.mrf.mxu0 }
 0x157   :  { %2564 = vpow2.f32 %v1273_v30  ;;  %v1255_v26 = vsub.f32 0.0, %v1205_v5  ;;  %v1111_v29 = vadd.f32 %v2230_v2, %v1014_v24  ;;  %v2120_v2 = vadd.f32 %v2958_v63, %v2955_v58 }
 0x158   :  { %v2559_v16 = vpop.eup %2558  ;;  %v2232_v27 = vpop.f32.mrf.mxu0 }
 0x159   :  { %v1275_v36 = vmul.f32 1.442695, %v1255_v26  ;;  %v2233_v13 = vadd.f32 %v2232_v27, %v2231_v31  ;;  %v1208_v33 = vadd.f32 %v1207_v3, %v1111_v29  ;;  %v1299_v37 = vadd.f32 1.0, %v2559_v16  ;;  %v1223_v26 = vpop.f32.mrf.mxu1 }
 0x15a   :  { %v2234_v40 = vpop.f32.mrf.mxu0  ;;  %v941_v32 = vadd.f32 %v2120_v2, %v2898_v57 }
 0x15b   :  { %v1116_v47 = vadd.f32 %v2233_v13, %v2940_v39  ;;  %v1256_v52 = vsub.f32 0.0, %v1208_v33  ;;  %2566 = vpow2.f32 %v1275_v36  ;;  %v933_v39 = vadd.f32 %v2114_v56, %v2898_v57 }
 0x15c   :  { %v2561_v54 = vpop.eup %2560  ;;  %v2235_v60 = vpop.f32.mrf.mxu0  ;;  %2568 = vrcp.f32 %v1299_v37 }
 0x15d   :  { %v1300_v62 = vadd.f32 1.0, %v2561_v54  ;;  %v1213_v38 = vadd.f32 %v2327_v9, %v1116_v47  ;;  %v1277_v41 = vmul.f32 1.442695, %v1256_v52  ;;  %v2236_v14 = vadd.f32 %v2235_v60, %v2234_v40  ;;  %v3025_v37 = vpop.f32.mrf.mxu1 }
 0x15e   :  { %v2237_v17 = vpop.f32.mrf.mxu0  ;;  %v1030_v30 = vadd.f32 %v2178_v8, %v933_v39 }
 0x15f   :  { %2570 = vrcp.f32 %v1300_v62  ;;  %v1257_v61 = vsub.f32 0.0, %v1213_v38  ;;  %v1119_v15 = vadd.f32 %v2236_v14, %v1022_v55 }
 0x160   :  { %v2563_v1 = vpop.eup %2562  ;;  %2572 = vpow2.f32 %v1277_v41  ;;  %v2238_v45 = vpop.f32.mrf.mxu0 }
 0x161   :  { %v1279_v49 = vmul.f32 1.442695, %v1257_v61  ;;  %v1216_v10 = vadd.f32 %v2328_v25, %v1119_v15  ;;  %v2239_v21 = vadd.f32 %v2238_v45, %v2237_v17  ;;  %v1301_v9 = vadd.f32 1.0, %v2563_v1 }
 0x162   :  { %v2240_v59 = vpop.f32.mrf.mxu0 }
 0x163   :  { %v1258_v18 = vsub.f32 0.0, %v1216_v10  ;;  %v1124_v19 = vadd.f32 %v2239_v21, %v2951_v51  ;;  %2574 = vpow2.f32 %v1279_v49  ;;  %v2184_v51 = vadd.f32 %v2964_v7, %v2960_v0 }
 0x164   :  { %v2565_v24 = vpop.eup %2564  ;;  %v2241_v5 = vpop.f32.mrf.mxu0  ;;  %2576 = vrcp.f32 %v1301_v9  ;;  %v2126_v0 = vadd.f32 %v2969_v20, %v2966_v12  ;;  %v2190_v12 = vadd.f32 %v2975_v28, %v2971_v22 }
 0x165   :  { %v1302_v31 = vadd.f32 1.0, %v2565_v24  ;;  %v1281_v50 = vmul.f32 1.442695, %v1258_v18  ;;  %v2242_v53 = vadd.f32 %v2241_v5, %v2240_v59  ;;  %v1221_v3 = vadd.f32 %v1220_v6, %v1124_v19  ;;  %v1236_v6 = vpop.f32.mrf.mxu1 }
 0x166   :  { %v2243_v25 = vpop.f32.mrf.mxu0  ;;  %v1038_v55 = vadd.f32 %v2184_v51, %v941_v32  ;;  %v949_v15 = vadd.f32 %v2126_v0, %v2898_v57  ;;  %v2132_v24 = vadd.f32 %v2980_v42, %v2977_v34  ;;  %v2196_v34 = vadd.f32 %v2988_v48, %v2984_v44 }
 0x167   :  { %2578 = vrcp.f32 %v1302_v31  ;;  %v1259_v29 = vsub.f32 0.0, %v1221_v3  ;;  %v1127_v16 = vadd.f32 %v2242_v53, %v1030_v30  ;;  %v2336_v10 = vpop.f32.mrf.mxu1 }
 0x168   :  { %2580 = vpow2.f32 %v1281_v50  ;;  %v2244_v35 = vpop.f32.mrf.mxu0  ;;  %v2567_v58 = vpop.eup %2566  ;;  %v1046_v19 = vadd.f32 %v2190_v12, %v949_v15 }
 0x169   :  { %v1283_v63 = vmul.f32 1.442695, %v1259_v29  ;;  %v2245_v27 = vadd.f32 %v2244_v35, %v2243_v25  ;;  %v1224_v36 = vadd.f32 %v1223_v26, %v1127_v16  ;;  %v1303_v13 = vadd.f32 1.0, %v2567_v58  ;;  %v2569_v40 = vpop.eup %2568  ;;  %v1239_v53 = vpop.f32.mrf.mxu1 }
 0x16a   :  { %v2246_v33 = vpop.f32.mrf.mxu0  ;;  %v957_v26 = vadd.f32 %v2132_v24, %v2898_v57 }
 0x16b   :  { %2582 = vpow2.f32 %v1283_v63  ;;  %v1132_v47 = vadd.f32 %v2245_v27, %v2962_v4  ;;  %v1260_v52 = vsub.f32 0.0, %v1224_v36 }
 0x16c   :  { %v2571_v54 = vpop.eup %2570  ;;  %v2247_v7 = vpop.f32.mrf.mxu0  ;;  %2584 = vrcp.f32 %v1303_v13  ;;  %v1054_v13 = vadd.f32 %v2196_v34, %v957_v26 }
 0x16d   :  { %v2573_v56 = vpop.eup %2572  ;;  %v1229_v60 = vadd.f32 %v3011_v43, %v1132_v47  ;;  %v1285_v62 = vmul.f32 1.442695, %v1260_v52  ;;  %v2248_v38 = vadd.f32 %v2247_v7, %v2246_v33  ;;  %v1331_v41 = vpack.c.bf16 %v2571_v54, %v2569_v40 }
 0x16e   :  { %v1304_v14 = vadd.f32 1.0, %v2573_v56  ;;  %v2249_v17 = vpop.f32.mrf.mxu0 }
 0x16f   :  { %v1261_v61 = vsub.f32 0.0, %v1229_v60  ;;  %2586 = vpow2.f32 %v1285_v62  ;;  %v1135_v4 = vadd.f32 %v2248_v38, %v1038_v55  ;;  %2353 = vmatprep.mubr.bf16.mxu1 %v1331_v41 }
 0x170   :  { %2588 = vrcp.f32 %v1304_v14  ;;  %v2250_v20 = vpop.f32.mrf.mxu0  ;;  %v2575_v1 = vpop.eup %2574 }
 0x171   :  { %v1287_v43 = vmul.f32 1.442695, %v1261_v61  ;;  %v1232_v39 = vadd.f32 %v2332_v11, %v1135_v4  ;;  %v2251_v8 = vadd.f32 %v2250_v20, %v2249_v17  ;;  %v1305_v45 = vadd.f32 1.0, %v2575_v1  ;;  %v2577_v21 = vpop.eup %2576 }
 0x172   :  { %v2252_v49 = vpop.f32.mrf.mxu0 }
 0x173   :  { %2590 = vpow2.f32 %v1287_v43  ;;  %v1262_v9 = vsub.f32 0.0, %v1232_v39  ;;  %v1140_v59 = vadd.f32 %v2251_v8, %v2973_v23 }
 0x174   :  { %v2579_v18 = vpop.eup %2578  ;;  %v2253_v22 = vpop.f32.mrf.mxu0  ;;  %2592 = vrcp.f32 %v1305_v45 }
 0x175   :  { %v2581_v28 = vpop.eup %2580  ;;  %v1289_v30 = vmul.f32 1.442695, %v1262_v9  ;;  %v2254_v2 = vadd.f32 %v2253_v22, %v2252_v49  ;;  %v1237_v5 = vadd.f32 %v1236_v6, %v1140_v59  ;;  %v1332_v11 = vpack.c.bf16 %v2579_v18, %v2577_v21 }
 0x176   :  { %v1306_v31 = vadd.f32 1.0, %v2581_v28  ;;  %v2255_v50 = vpop.f32.mrf.mxu0  ;;  %v2554_v28 = vld [vmem:[%s3194_s5 + $0x18] sm:$0xff]  }
 0x177   :  { %2594 = vpow2.f32 %v1289_v30  ;;  %v1263_v3 = vsub.f32 0.0, %v1237_v5  ;;  %2354 = vmatmul.mubr.bf16.vlgmr.msra.gmra.mxu1 %v1332_v11  ;;  %v1143_v25 = vadd.f32 %v2254_v2, %v1046_v19  ;;  %2369 = vmatprep.subr.bf16.mxu0 %v2554_v28  ;;  %v2555_v30 = vld [vmem:[%s3194_s5 + $0x10] sm:$0xff]   ;;  %v2556_v2 = vld [vmem:[%s3194_s5 + $0x8] sm:$0xff]   ;;  %v2557_v5 = vld [vmem:[%s3194_s5] sm:$0xff]  }
 0x178   :  { %v2583_v23 = vpop.eup %2582  ;;  %2596 = vrcp.f32 %v1306_v31  ;;  %v2256_v42 = vpop.f32.mrf.mxu0  ;;  %2393 = vmatprep.subr.bf16.mxu1 %v2554_v28  ;;  %2370 = vmatpush3.bf16.msra.mxu0 %v2554_v28  ;;  %v3057_v11 = vld [vmem:[%s3193_s4] ss:$0 sm:$0xff] }
 0x179   :  { %v1291_v29 = vmul.f32 1.442695, %v1263_v3  ;;  %v2257_v16 = vadd.f32 %v2256_v42, %v2255_v50  ;;  %v1240_v32 = vadd.f32 %v1239_v53, %v1143_v25  ;;  %v1307_v51 = vadd.f32 1.0, %v2583_v23  ;;  %v2585_v58 = vpop.eup %2584  ;;  %2397 = vmatpush3.bf16.msra.mxu1 %v2554_v28  ;;  %2371 = vmatprep.subr.bf16.mxu0 %v2555_v30 }
 0x17a   :  { %v2258_v35 = vpop.f32.mrf.mxu0  ;;  %2394 = vmatprep.subr.bf16.mxu1 %v2555_v30 }
 0x17b   :  { %v1148_v63 = vadd.f32 %v2257_v16, %v2986_v46  ;;  %v1264_v27 = vsub.f32 0.0, %v1240_v32  ;;  %2598 = vpow2.f32 %v1291_v29 }
 0x17c   :  { %v2587_v36 = vpop.eup %2586  ;;  %v2259_v33 = vpop.f32.mrf.mxu0  ;;  %2600 = vrcp.f32 %v1307_v51  ;;  %2372 = vmatpush3.bf16.msra.mxu0 %v2555_v30 }
 0x17d   :  { %v2589_v40 = vpop.eup %2588  ;;  %v1308_v57 = vadd.f32 1.0, %v2587_v36  ;;  %v1245_v47 = vadd.f32 %v3025_v37, %v1148_v63  ;;  %v1293_v44 = vmul.f32 1.442695, %v1264_v27  ;;  %v2260_v48 = vadd.f32 %v2259_v33, %v2258_v35  ;;  %2398 = vmatpush3.bf16.msra.mxu1 %v2555_v30  ;;  %2373 = vmatprep.subr.bf16.mxu0 %v2556_v2 }
 0x17e   :  { %v1333_v52 = vpack.c.bf16 %v2589_v40, %v2585_v58  ;;  %2395 = vmatprep.subr.bf16.mxu1 %v2556_v2 }
 0x17f   :  { %2602 = vrcp.f32 %v1308_v57  ;;  %v1265_v54 = vsub.f32 0.0, %v1245_v47  ;;  %v1151_v55 = vadd.f32 %v2260_v48, %v1054_v13 }
 0x180   :  { %v2591_v0 = vpop.eup %2590  ;;  %2604 = vpow2.f32 %v1293_v44  ;;  %2357 = vmatprep.mubr.bf16.mxu1 %v1333_v52  ;;  %2374 = vmatpush3.bf16.msra.mxu0 %v2556_v2 }
 0x181   :  { %v1295_v46 = vmul.f32 1.442695, %v1265_v54  ;;  %v1248_v7 = vadd.f32 %v2336_v10, %v1151_v55  ;;  %v1309_v56 = vadd.f32 1.0, %v2591_v0  ;;  %v2593_v60 = vpop.eup %2592  ;;  %2399 = vmatpush3.bf16.msra.mxu1 %v2556_v2  ;;  %2375 = vmatprep.subr.bf16.mxu0 %v2557_v5 }
 0x182   :  { %2396 = vmatprep.subr.bf16.mxu1 %v2557_v5 }
 0x183   :  { %v1266_v62 = vsub.f32 0.0, %v1248_v7  ;;  %2606 = vpow2.f32 %v1295_v46 }
 0x184   :  { %v2595_v38 = vpop.eup %2594  ;;  %2608 = vrcp.f32 %v1309_v56  ;;  %2376 = vmatpush3.bf16.msra.mxu0 %v2557_v5 }
 0x185   :  { %v2597_v41 = vpop.eup %2596  ;;  %v1310_v14 = vadd.f32 1.0, %v2595_v38  ;;  %v1297_v37 = vmul.f32 1.442695, %v1266_v62  ;;  %2400 = vmatpush3.bf16.msra.mxu1 %v2557_v5 }
 0x186   :  { %v1334_v17 = vpack.c.bf16 %v2597_v41, %v2593_v60 }
 0x187   :  { %2610 = vrcp.f32 %v1310_v14 }
 0x188   :  { %2612 = vpow2.f32 %v1297_v37  ;;  %2358 = vmatmul.mubr.bf16.gmra.mxu1 %v1334_v17  ;;  %v2599_v6 = vpop.eup %2598 }
 0x189   :  { %v2601_v61 = vpop.eup %2600  ;;  %v1311_v4 = vadd.f32 1.0, %v2599_v6 }
 0x18b   :  { %2614 = vrcp.f32 %v1311_v4 }
 0x18c   :  { %v2603_v15 = vpop.eup %2602 }
 0x18d   :  { %v2605_v12 = vpop.eup %2604  ;;  %v1335_v20 = vpack.c.bf16 %v2603_v15, %v2601_v61 }
 0x18e   :  { %v1312_v1 = vadd.f32 1.0, %v2605_v12 }
 0x18f   :  { %2361 = vmatprep.mubr.bf16.mxu1 %v1335_v20 }
 0x190   :  { %2616 = vrcp.f32 %v1312_v1  ;;  %v2607_v43 = vpop.eup %2606 }
 0x191   :  { %v2609_v39 = vpop.eup %2608  ;;  %v1313_v8 = vadd.f32 1.0, %v2607_v43 }
 0x193   :  { %2618 = vrcp.f32 %v1313_v8 }
 0x194   :  { %v2611_v45 = vpop.eup %2610 }
 0x195   :  { %v2613_v49 = vpop.eup %2612  ;;  %v1336_v10 = vpack.c.bf16 %v2611_v45, %v2609_v39 }
 0x196   :  { %v1314_v21 = vadd.f32 1.0, %v2613_v49 }
 0x197   :  { %2362 = vmatmul.mubr.bf16.gmra.mxu1 %v1336_v10 }
 0x198   :  { %2620 = vrcp.f32 %v1314_v21  ;;  %v2615_v9 = vpop.eup %2614 }
 0x19d   :  { %v2617_v59 = vpop.eup %2616 }
 0x19e   :  { %v1337_v18 = vpack.c.bf16 %v2617_v59, %v2615_v9 }
 0x1a0   :  { %2365 = vmatprep.mubr.bf16.mxu1 %v1337_v18  ;;  %v2619_v19 = vpop.eup %2618 }
 0x1a5   :  { %v2621_v24 = vpop.eup %2620 }
 0x1a6   :  { %v1338_v22 = vpack.c.bf16 %v2621_v24, %v2619_v19 }
 0x1a8   :  { %2366 = vmatmul.mubr.bf16.gmra.mxu1 %v1338_v22 }
 0x237   :  { %v2355_v31 = vpop.f32.mrf.mxu1 }
 0x238   :  { %v1453_v50 = vadd.f32 %v2355_v31, %v3057_v11 }
 0x239   :  { %v1444_v53 = vpop.f32.mrf.mxu1 }
 0x23a   :  { %v1509_v3 = vsub.f32 0.0, %v1453_v50  ;;  %v1445_v25 = vadd.f32 %v3057_v11, %v1444_v53 }
 0x23b   :  { %v2356_v23 = vpop.f32.mrf.mxu1 }
 0x23c   :  { %v1527_v26 = vmul.f32 1.442695, %v1509_v3  ;;  %v1507_v34 = vsub.f32 0.0, %v1445_v25  ;;  %v1456_v42 = vadd.f32 %v2356_v23, %v3057_v11 }
 0x23d   :  { %v1447_v29 = vpop.f32.mrf.mxu1 }
 0x23e   :  { %2622 = vpow2.f32 %v1527_v26  ;;  %v1523_v16 = vmul.f32 1.442695, %v1507_v34  ;;  %v1510_v32 = vsub.f32 0.0, %v1456_v42  ;;  %v1448_v51 = vadd.f32 %v3057_v11, %v1447_v29 }
 0x240   :  { %2624 = vpow2.f32 %v1523_v16  ;;  %v1529_v35 = vmul.f32 1.442695, %v1510_v32  ;;  %v1508_v58 = vsub.f32 0.0, %v1448_v51 }
 0x242   :  { %2626 = vpow2.f32 %v1529_v35  ;;  %v1525_v63 = vmul.f32 1.442695, %v1508_v58 }
 0x244   :  { %2628 = vpow2.f32 %v1525_v63 }
 0x248   :  { %v2359_v27 = vpop.f32.mrf.mxu1 }
 0x249   :  { %v1469_v36 = vadd.f32 %v2359_v27, %v3057_v11 }
 0x24a   :  { %v1460_v13 = vpop.f32.mrf.mxu1 }
 0x24b   :  { %v2623_v33 = vpop.eup %2622  ;;  %v1513_v40 = vsub.f32 0.0, %v1469_v36  ;;  %v1461_v57 = vadd.f32 %v3057_v11, %v1460_v13 }
 0x24c   :  { %v1557_v47 = vadd.f32 1.0, %v2623_v33  ;;  %v2360_v44 = vpop.f32.mrf.mxu1 }
 0x24d   :  { %v2625_v48 = vpop.eup %2624  ;;  %v1535_v52 = vmul.f32 1.442695, %v1513_v40  ;;  %v1511_v54 = vsub.f32 0.0, %v1461_v57  ;;  %v1472_v55 = vadd.f32 %v2360_v44, %v3057_v11 }
 0x24e   :  { %2630 = vrcp.f32 %v1557_v47  ;;  %v1555_v0 = vadd.f32 1.0, %v2625_v48  ;;  %v1463_v46 = vpop.f32.mrf.mxu1 }
 0x24f   :  { %v2627_v7 = vpop.eup %2626  ;;  %2632 = vpow2.f32 %v1535_v52  ;;  %v1531_v56 = vmul.f32 1.442695, %v1511_v54  ;;  %v1514_v60 = vsub.f32 0.0, %v1472_v55  ;;  %v1464_v62 = vadd.f32 %v3057_v11, %v1463_v46 }
 0x250   :  { %2634 = vrcp.f32 %v1555_v0  ;;  %v1558_v38 = vadd.f32 1.0, %v2627_v7 }
 0x251   :  { %v2629_v41 = vpop.eup %2628  ;;  %2636 = vpow2.f32 %v1531_v56  ;;  %v1537_v14 = vmul.f32 1.442695, %v1514_v60  ;;  %v1512_v37 = vsub.f32 0.0, %v1464_v62 }
 0x252   :  { %2638 = vrcp.f32 %v1558_v38  ;;  %v1556_v17 = vadd.f32 1.0, %v2629_v41 }
 0x253   :  { %2640 = vpow2.f32 %v1537_v14  ;;  %v1533_v6 = vmul.f32 1.442695, %v1512_v37 }
 0x254   :  { %2642 = vrcp.f32 %v1556_v17 }
 0x255   :  { %2644 = vpow2.f32 %v1533_v6 }
 0x257   :  { %v2363_v61 = vpop.f32.mrf.mxu1 }
 0x258   :  { %v1485_v4 = vadd.f32 %v2363_v61, %v3057_v11 }
 0x259   :  { %v1476_v15 = vpop.f32.mrf.mxu1 }
 0x25a   :  { %v1517_v12 = vsub.f32 0.0, %v1485_v4  ;;  %v1477_v20 = vadd.f32 %v3057_v11, %v1476_v15 }
 0x25b   :  { %v2631_v1 = vpop.eup %2630  ;;  %v2364_v43 = vpop.f32.mrf.mxu1 }
 0x25c   :  { %v2633_v39 = vpop.eup %2632  ;;  %v1543_v8 = vmul.f32 1.442695, %v1517_v12  ;;  %v1515_v45 = vsub.f32 0.0, %v1477_v20  ;;  %v1488_v49 = vadd.f32 %v2364_v43, %v3057_v11 }
 0x25d   :  { %v2635_v10 = vpop.eup %2634  ;;  %v1479_v21 = vpop.f32.mrf.mxu1  ;;  %v1561_v53 = vadd.f32 1.0, %v2633_v39 }
 0x25e   :  { %v2637_v9 = vpop.eup %2636  ;;  %2646 = vpow2.f32 %v1543_v8  ;;  %v1539_v59 = vmul.f32 1.442695, %v1515_v45  ;;  %v1518_v18 = vsub.f32 0.0, %v1488_v49  ;;  %v1480_v19 = vadd.f32 %v3057_v11, %v1479_v21 }
 0x25f   :  { %v2639_v24 = vpop.eup %2638  ;;  %v1559_v22 = vadd.f32 1.0, %v2637_v9 }
 0x260   :  { %v2641_v28 = vpop.eup %2640  ;;  %2648 = vpow2.f32 %v1539_v59  ;;  %v1545_v30 = vmul.f32 1.442695, %v1518_v18  ;;  %v1516_v2 = vsub.f32 0.0, %v1480_v19  ;;  %v1588_v26 = vpack.c.bf16 %v2639_v24, %v2631_v1  ;;  %v2056_v19 = vld [vmem:[%s3195_s6] ss:$0 sm:$0xff]  ;;  %s2822_s6 = smov [#allocation7]  }
 0x261   :  { %v2643_v5 = vpop.eup %2642  ;;  %2650 = vrcp.f32 %v1559_v22  ;;  %v1562_v31 = vadd.f32 1.0, %v2641_v28  ;;  %s1921_s1 = sshll.u32 %s2822_s6, 4  ;;  %s1922_s1 = int_to_ptr.vmem [resolvable:$true] %s1921_s1 }
 0x262   :  { %v2645_v50 = vpop.eup %2644  ;;  %2652 = vpow2.f32 %v1545_v30  ;;  %v1541_v3 = vmul.f32 1.442695, %v1516_v2  ;;  %v1587_v25 = vpack.c.bf16 %v2643_v5, %v2635_v10  ;;  %s2790_s15 = scalar_lea.vmem %s1922_s1, 2048  ;;  %p2795_p11 = scmp.lt.s32.totalorder %s1922_s1, %s1922_s1 }
 0x263   :  { %2654 = vrcp.f32 %v1562_v31  ;;  %v1560_v23 = vadd.f32 1.0, %v2645_v50  ;;  %p2791_p10 = scmp.ne.s32.totalorder %s1922_s1, %s2790_s15  ;;  %p2796_p12 = scmp.lt.s32.totalorder %s2790_s15, %s2790_s15 }
 0x264   :  { %2656 = vpow2.f32 %v1541_v3  ;;  %2377 = vmatprep.mubr.msk.bf16.mxu0 %vm1634_vm0, %v1587_v25 }
 0x265   :  { %2658 = vrcp.f32 %v1560_v23  ;;  %2378 = vmatmul.mubr.msk.bf16.vlgmr.msra.gmra.mxu0 %vm1634_vm0, %v1588_v26  ;;  %p2797_p13 = por %p2796_p12, %p2795_p11 }
 0x266   :  { %2660 = vrcp.f32 %v1561_v53 }
 0x267   :  { %p2798_p0 = pnand %p2797_p13, %p2791_p10 }
 0x268   :  { %v2367_v34 = vpop.f32.mrf.mxu1 }
 0x269   :  { %v1501_v42 = vadd.f32 %v2367_v34, %v3057_v11 }
 0x26a   :  { %v1492_v29 = vpop.f32.mrf.mxu1 }
 0x26b   :  { %v2647_v16 = vpop.eup %2646  ;;  %v1521_v32 = vsub.f32 0.0, %v1501_v42  ;;  %v1493_v51 = vadd.f32 %v3057_v11, %v1492_v29 }
 0x26c   :  { %v1565_v35 = vadd.f32 1.0, %v2647_v16  ;;  %v2368_v58 = vpop.f32.mrf.mxu1 }
 0x26d   :  { %v2649_v63 = vpop.eup %2648  ;;  %v1551_v27 = vmul.f32 1.442695, %v1521_v32  ;;  %v1519_v36 = vsub.f32 0.0, %v1493_v51  ;;  %v1504_v13 = vadd.f32 %v2368_v58, %v3057_v11 }
 0x26e   :  { %v2651_v33 = vpop.eup %2650  ;;  %2662 = vrcp.f32 %v1565_v35  ;;  %v1563_v40 = vadd.f32 1.0, %v2649_v63  ;;  %v1495_v57 = vpop.f32.mrf.mxu1 }
 0x26f   :  { %v2653_v47 = vpop.eup %2652  ;;  %2664 = vpow2.f32 %v1551_v27  ;;  %v1547_v44 = vmul.f32 1.442695, %v1519_v36  ;;  %v1522_v48 = vsub.f32 0.0, %v1504_v13  ;;  %v1496_v52 = vadd.f32 %v3057_v11, %v1495_v57 }
 0x270   :  { %v2655_v54 = vpop.eup %2654  ;;  %2666 = vrcp.f32 %v1563_v40  ;;  %v1566_v55 = vadd.f32 1.0, %v2653_v47 }
 0x271   :  { %v2657_v0 = vpop.eup %2656  ;;  %2668 = vpow2.f32 %v1547_v44  ;;  %v1553_v46 = vmul.f32 1.442695, %v1522_v48  ;;  %v1520_v7 = vsub.f32 0.0, %v1496_v52 }
 0x272   :  { %v2659_v56 = vpop.eup %2658  ;;  %2670 = vrcp.f32 %v1566_v55  ;;  %v1564_v60 = vadd.f32 1.0, %v2657_v0 }
 0x273   :  { %v2661_v62 = vpop.eup %2660  ;;  %2672 = vpow2.f32 %v1553_v46  ;;  %v1549_v38 = vmul.f32 1.442695, %v1520_v7  ;;  %v1589_v41 = vpack.c.bf16 %v2659_v56, %v2651_v33 }
 0x274   :  { %2674 = vrcp.f32 %v1564_v60  ;;  %v1590_v14 = vpack.c.bf16 %v2655_v54, %v2661_v62 }
 0x275   :  { %2676 = vpow2.f32 %v1549_v38  ;;  %2381 = vmatprep.mubr.msk.bf16.mxu0 %vm1634_vm0, %v1589_v41 }
 0x276   :  { %2382 = vmatmul.mubr.msk.bf16.gmra.mxu0 %vm1634_vm0, %v1590_v14 }
 0x27b   :  { %v2663_v11 = vpop.eup %2662 }
 0x27c   :  { %v2665_v37 = vpop.eup %2664 }
 0x27d   :  { %v2667_v17 = vpop.eup %2666  ;;  %v1569_v43 = vadd.f32 1.0, %v2665_v37 }
 0x27e   :  { %v2669_v6 = vpop.eup %2668 }
 0x27f   :  { %v2671_v61 = vpop.eup %2670  ;;  %v1567_v4 = vadd.f32 1.0, %v2669_v6 }
 0x280   :  { %v2673_v15 = vpop.eup %2672  ;;  %v1592_v45 = vpack.c.bf16 %v2671_v61, %v2663_v11 }
 0x281   :  { %v2675_v12 = vpop.eup %2674  ;;  %v1570_v20 = vadd.f32 1.0, %v2673_v15  ;;  %2678 = vrcp.f32 %v1567_v4 }
 0x282   :  { %v2677_v1 = vpop.eup %2676  ;;  %v1591_v39 = vpack.c.bf16 %v2675_v12, %v2667_v17 }
 0x283   :  { %v1568_v8 = vadd.f32 1.0, %v2677_v1  ;;  %2680 = vrcp.f32 %v1570_v20 }
 0x284   :  { %2385 = vmatprep.mubr.msk.bf16.mxu1 %vm1634_vm0, %v1591_v39 }
 0x285   :  { %2682 = vrcp.f32 %v1568_v8  ;;  %2386 = vmatmul.mubr.msk.bf16.vlgmr.msra.gmra.mxu1 %vm1634_vm0, %v1592_v45 }
 0x286   :  { %2684 = vrcp.f32 %v1569_v43 }
 0x28e   :  { %v2679_v49 = vpop.eup %2678 }
 0x290   :  { %v2681_v10 = vpop.eup %2680 }
 0x292   :  { %v2683_v21 = vpop.eup %2682 }
 0x293   :  { %v2685_v9 = vpop.eup %2684  ;;  %v1593_v59 = vpack.c.bf16 %v2683_v21, %v2679_v49 }
 0x294   :  { %v1594_v18 = vpack.c.bf16 %v2681_v10, %v2685_v9 }
 0x295   :  { %2389 = vmatprep.mubr.msk.bf16.mxu1 %vm1634_vm0, %v1593_v59 }
 0x296   :  { %2390 = vmatmul.mubr.msk.bf16.gmra.mxu1 %vm1634_vm0, %v1594_v18 }
 0x325   :  { %v2379_v24 = vpop.f32.mrf.mxu0 }
 0x326   :  { %v1702_v22 = vadd.f32 %v2379_v24, %v2056_v19 }
 0x327   :  { %v1693_v28 = vpop.f32.mrf.mxu0 }
 0x328   :  { %v1694_v30 = vadd.f32 %v2056_v19, %v1693_v28  ;;  %1760 = vmax.xlane.f32.xlu1 %v1702_v22 }
 0x329   :  { %v2380_v2 = vpop.f32.mrf.mxu0 }
 0x32a   :  { %v1705_v5 = vadd.f32 %v2380_v2, %v2056_v19  ;;  %1756 = vmax.xlane.f32.xlu0 %v1694_v30 }
 0x32b   :  { %v1696_v31 = vpop.f32.mrf.mxu0 }
 0x32c   :  { %v1697_v50 = vadd.f32 %v2056_v19, %v1696_v31  ;;  %1762 = vmax.xlane.f32.xlu1 %v1705_v5 }
 0x32e   :  { %1758 = vmax.xlane.f32.xlu0 %v1697_v50 }
 0x336   :  { %v2383_v53 = vpop.f32.mrf.mxu0 }
 0x337   :  { %v1718_v3 = vadd.f32 %v2383_v53, %v2056_v19 }
 0x338   :  { %v1709_v25 = vpop.f32.mrf.mxu0 }
 0x339   :  { %1768 = vmax.xlane.f32.xlu0 %v1718_v3  ;;  %v1710_v26 = vadd.f32 %v2056_v19, %v1709_v25 }
 0x33a   :  { %v2384_v23 = vpop.f32.mrf.mxu0 }
 0x33b   :  { %v1721_v34 = vadd.f32 %v2384_v23, %v2056_v19 }
 0x33c   :  { %v1712_v42 = vpop.f32.mrf.mxu0 }
 0x33d   :  { %1770 = vmax.xlane.f32.xlu1 %v1721_v34  ;;  %1764 = vmax.xlane.f32.xlu0 %v1710_v26  ;;  %v3086_v29 = vadd.f32 %v2056_v19, %v1712_v42 }
 0x341   :  { %1766 = vmax.xlane.f32.xlu1 %v3086_v29 }
 0x345   :  { %v2387_v16 = vpop.f32.mrf.mxu1 }
 0x346   :  { %v3089_v32 = vadd.f32 %v2387_v16, %v2056_v19 }
 0x347   :  { %v1725_v51 = vpop.f32.mrf.mxu1 }
 0x348   :  { %1776 = vmax.xlane.f32.xlu0 %v3089_v32  ;;  %v3092_v58 = vadd.f32 %v2056_v19, %v1725_v51 }
 0x349   :  { %v2388_v35 = vpop.f32.mrf.mxu1 }
 0x34a   :  { %v3094_v63 = vadd.f32 %v2388_v35, %v2056_v19 }
 0x34b   :  { %v1728_v27 = vpop.f32.mrf.mxu1 }
 0x34c   :  { %1778 = vmax.xlane.f32.xlu1 %v3094_v63  ;;  %1772 = vmax.xlane.f32.xlu0 %v3092_v58  ;;  %v3098_v36 = vadd.f32 %v2056_v19, %v1728_v27 }
 0x350   :  { %1774 = vmax.xlane.f32.xlu1 %v3098_v36 }
 0x356   :  { %v2391_v13 = vpop.f32.mrf.mxu1 }
 0x357   :  { %v3104_v44 = vadd.f32 %v2391_v13, %v2056_v19 }
 0x358   :  { %v1741_v33 = vpop.f32.mrf.mxu1 }
 0x359   :  { %v3101_v40 = vadd.f32 %v2056_v19, %v1741_v33 }
 0x35a   :  { %v2392_v57 = vpop.f32.mrf.mxu1 }
 0x35b   :  { %1780 = vmax.xlane.f32.xlu0 %v3101_v40  ;;  %v3110_v52 = vadd.f32 %v2392_v57, %v2056_v19 }
 0x35c   :  { %v1744_v47 = vpop.f32.mrf.mxu1 }
 0x35d   :  { %v3106_v48 = vadd.f32 %v2056_v19, %v1744_v47 }
 0x35f   :  { %1782 = vmax.xlane.f32.xlu1 %v3106_v48  ;;  %1784 = vmax.xlane.f32.xlu0 %v3104_v44 }
 0x363   :  { %1786 = vmax.xlane.f32.xlu1 %v3110_v52 }
 0x3b1   :  { %v1761_v54 = vpop.xlane.xlu1 %1760 }
 0x3b2   :  { %v1790_v55 = vsub.f32 %v1702_v22, %v1761_v54 }
 0x3b3   :  { %v1757_v0 = vpop.xlane.xlu0 %1756 }
 0x3b4   :  { %v1808_v46 = vmul.f32 1.442695, %v1790_v55  ;;  %v1788_v7 = vsub.f32 %v1694_v30, %v1757_v0 }
 0x3b5   :  { %v1763_v56 = vpop.xlane.xlu1 %1762 }
 0x3b6   :  { %2686 = vpow2.f32 %v1808_v46  ;;  %v1804_v60 = vmul.f32 1.442695, %v1788_v7  ;;  %v1791_v62 = vsub.f32 %v1705_v5, %v1763_v56 }
 0x3b7   :  { %v1759_v38 = vpop.xlane.xlu0 %1758 }
 0x3b8   :  { %v1810_v41 = vmul.f32 1.442695, %v1791_v62  ;;  %v1789_v14 = vsub.f32 %v1697_v50, %v1759_v38  ;;  %2688 = vpow2.f32 %v1804_v60 }
 0x3ba   :  { %2690 = vpow2.f32 %v1810_v41  ;;  %v1806_v11 = vmul.f32 1.442695, %v1789_v14 }
 0x3bc   :  { %2692 = vpow2.f32 %v1806_v11 }
 0x3c2   :  { %v1769_v37 = vpop.xlane.xlu0 %1768 }
 0x3c3   :  { %v3113_v17 = vpop.eup %2686  ;;  %v1794_v6 = vsub.f32 %v1718_v3, %v1769_v37 }
 0x3c4   :  { %1840 = vadd.xlane.f32.xlu0 %v3113_v17 }
 0x3c5   :  { %v1816_v61 = vmul.f32 1.442695, %v1794_v6  ;;  %v3116_v4 = vpop.eup %2688 }
 0x3c6   :  { %v1771_v15 = vpop.xlane.xlu1 %1770  ;;  %v1765_v12 = vpop.xlane.xlu0 %1764 }
 0x3c7   :  { %v3118_v20 = vpop.eup %2690  ;;  %2694 = vpow2.f32 %v1816_v61  ;;  %v1795_v1 = vsub.f32 %v1721_v34, %v1771_v15  ;;  %v1792_v43 = vsub.f32 %v1710_v26, %v1765_v12 }
 0x3c8   :  { %1842 = vadd.xlane.f32.xlu1 %v3118_v20  ;;  %1836 = vadd.xlane.f32.xlu0 %v3116_v4 }
 0x3c9   :  { %v1818_v39 = vmul.f32 1.442695, %v1795_v1  ;;  %v1812_v8 = vmul.f32 1.442695, %v1792_v43  ;;  %v3122_v49 = vpop.eup %2692 }
 0x3ca   :  { %v1767_v45 = vpop.xlane.xlu1 %1766 }
 0x3cb   :  { %2696 = vpow2.f32 %v1818_v39  ;;  %v1793_v10 = vsub.f32 %v3086_v29, %v1767_v45 }
 0x3cc   :  { %2698 = vpow2.f32 %v1812_v8  ;;  %1838 = vadd.xlane.f32.xlu1 %v3122_v49 }
 0x3cd   :  { %v1814_v21 = vmul.f32 1.442695, %v1793_v10 }
 0x3cf   :  { %2700 = vpow2.f32 %v1814_v21 }
 0x3d1   :  { %v1777_v9 = vpop.xlane.xlu0 %1776 }
 0x3d2   :  { %v1798_v59 = vsub.f32 %v3089_v32, %v1777_v9 }
 0x3d4   :  { %v3127_v18 = vpop.eup %2694  ;;  %v1824_v19 = vmul.f32 1.442695, %v1798_v59 }
 0x3d5   :  { %1848 = vadd.xlane.f32.xlu0 %v3127_v18  ;;  %v1779_v24 = vpop.xlane.xlu1 %1778  ;;  %v1773_v22 = vpop.xlane.xlu0 %1772 }
 0x3d6   :  { %2702 = vpow2.f32 %v1824_v19  ;;  %v1799_v28 = vsub.f32 %v3094_v63, %v1779_v24  ;;  %v1796_v30 = vsub.f32 %v3092_v58, %v1773_v22 }
 0x3d8   :  { %v3132_v2 = vpop.eup %2696  ;;  %v1826_v5 = vmul.f32 1.442695, %v1799_v28  ;;  %v1820_v31 = vmul.f32 1.442695, %v1796_v30 }
 0x3d9   :  { %v3134_v50 = vpop.eup %2698  ;;  %1850 = vadd.xlane.f32.xlu1 %v3132_v2  ;;  %v1775_v53 = vpop.xlane.xlu1 %1774 }
 0x3da   :  { %2704 = vpow2.f32 %v1826_v5  ;;  %1844 = vadd.xlane.f32.xlu0 %v3134_v50  ;;  %v1797_v3 = vsub.f32 %v3098_v36, %v1775_v53 }
 0x3db   :  { %2706 = vpow2.f32 %v1820_v31 }
 0x3dc   :  { %v3139_v25 = vpop.eup %2700  ;;  %v1822_v23 = vmul.f32 1.442695, %v1797_v3 }
 0x3dd   :  { %1846 = vadd.xlane.f32.xlu1 %v3139_v25 }
 0x3de   :  { %2708 = vpow2.f32 %v1822_v23 }
 0x3e3   :  { %v3142_v26 = vpop.eup %2702 }
 0x3e4   :  { %v1781_v34 = vpop.xlane.xlu0 %1780  ;;  %1856 = vadd.xlane.f32.xlu0 %v3142_v26 }
 0x3e5   :  { %v1800_v42 = vsub.f32 %v3101_v40, %v1781_v34 }
 0x3e7   :  { %v3146_v29 = vpop.eup %2704  ;;  %v1828_v16 = vmul.f32 1.442695, %v1800_v42 }
 0x3e8   :  { %v3148_v32 = vpop.eup %2706  ;;  %v1783_v51 = vpop.xlane.xlu1 %1782  ;;  %1858 = vadd.xlane.f32.xlu1 %v3146_v29 }
 0x3e9   :  { %v1785_v35 = vpop.xlane.xlu0 %1784  ;;  %2710 = vpow2.f32 %v1828_v16  ;;  %v1801_v58 = vsub.f32 %v3106_v48, %v1783_v51  ;;  %1852 = vadd.xlane.f32.xlu0 %v3148_v32 }
 0x3ea   :  { %v1802_v63 = vsub.f32 %v3104_v44, %v1785_v35 }
 0x3eb   :  { %v3154_v27 = vpop.eup %2708  ;;  %v1830_v36 = vmul.f32 1.442695, %v1801_v58 }
 0x3ec   :  { %v1832_v13 = vmul.f32 1.442695, %v1802_v63  ;;  %v1787_v33 = vpop.xlane.xlu1 %1786  ;;  %1854 = vadd.xlane.f32.xlu1 %v3154_v27 }
 0x3ed   :  { %2712 = vpow2.f32 %v1830_v36  ;;  %v1803_v40 = vsub.f32 %v3110_v52, %v1787_v33 }
 0x3ee   :  { %2714 = vpow2.f32 %v1832_v13 }
 0x3ef   :  { %v1834_v57 = vmul.f32 1.442695, %v1803_v40 }
 0x3f1   :  { %2716 = vpow2.f32 %v1834_v57 }
 0x3f6   :  { %v3158_v47 = vpop.eup %2710 }
 0x3f7   :  { %1860 = vadd.xlane.f32.xlu0 %v3158_v47 }
 0x3fa   :  { %v3161_v44 = vpop.eup %2712 }
 0x3fb   :  { %v3163_v48 = vpop.eup %2714  ;;  %1862 = vadd.xlane.f32.xlu1 %v3161_v44 }
 0x3fc   :  { %1864 = vadd.xlane.f32.xlu0 %v3163_v48 }
 0x3fe   :  { %v3167_v54 = vpop.eup %2716 }
 0x3ff   :  { %1866 = vadd.xlane.f32.xlu1 %v3167_v54 }
 0x44d   :  { %v1841_v52 = vpop.xlane.xlu0 %1840 }
 0x44e   :  { %2718 = vrcp.f32 %v1841_v52 }
 0x451   :  { %v1843_v55 = vpop.xlane.xlu1 %1842  ;;  %v1837_v0 = vpop.xlane.xlu0 %1836 }
 0x452   :  { %2720 = vrcp.f32 %v1843_v55 }
 0x453   :  { %2722 = vrcp.f32 %v1837_v0 }
 0x455   :  { %v1839_v46 = vpop.xlane.xlu1 %1838 }
 0x456   :  { %2724 = vrcp.f32 %v1839_v46 }
 0x45b   :  { %v2719_v7 = vpop.eup %2718 }
 0x45c   :  { %v1886_v56 = vmul.f32 %v2719_v7, %v3113_v17 }
 0x45e   :  { %1902 = vst [vmem:[#allocation7 + $0x10] sm:$0xff] %v1886_v56  ;;  %v1849_v60 = vpop.xlane.xlu0 %1848 }
 0x45f   :  { %v2721_v62 = vpop.eup %2720  ;;  %2726 = vrcp.f32 %v1849_v60 }
 0x460   :  { %v2723_v38 = vpop.eup %2722  ;;  %v1887_v41 = vmul.f32 %v2721_v62, %v3118_v20 }
 0x461   :  { %v1884_v14 = vmul.f32 %v2723_v38, %v3116_v4 }
 0x462   :  { %1903 = vst [vmem:[#allocation7 + $0x18] sm:$0xff] %v1887_v41  ;;  %v1851_v11 = vpop.xlane.xlu1 %1850 }
 0x463   :  { %v2725_v37 = vpop.eup %2724  ;;  %1900 = vst [vmem:[#allocation7] sm:$0xff] %v1884_v14  ;;  %2728 = vrcp.f32 %v1851_v11  ;;  %v1845_v6 = vpop.xlane.xlu0 %1844 }
 0x464   :  { %v1885_v61 = vmul.f32 %v2725_v37, %v3122_v49  ;;  %2730 = vrcp.f32 %v1845_v6 }
 0x466   :  { %1901 = vst [vmem:[#allocation7 + $0x8] sm:$0xff] %v1885_v61  ;;  %v1847_v17 = vpop.xlane.xlu1 %1846 }
 0x467   :  { %2732 = vrcp.f32 %v1847_v17 }
 0x46c   :  { %v2727_v15 = vpop.eup %2726 }
 0x46d   :  { %v1890_v12 = vmul.f32 %v2727_v15, %v3127_v18  ;;  %v1857_v1 = vpop.xlane.xlu0 %1856 }
 0x46e   :  { %2734 = vrcp.f32 %v1857_v1 }
 0x46f   :  { %1906 = vst [vmem:[#allocation7 + $0x30] sm:$0xff] %v1890_v12 }
 0x470   :  { %v2729_v20 = vpop.eup %2728 }
 0x471   :  { %v2731_v4 = vpop.eup %2730  ;;  %v1891_v43 = vmul.f32 %v2729_v20, %v3132_v2  ;;  %v1859_v39 = vpop.xlane.xlu1 %1858 }
 0x472   :  { %v1888_v8 = vmul.f32 %v2731_v4, %v3134_v50  ;;  %2736 = vrcp.f32 %v1859_v39  ;;  %v1853_v45 = vpop.xlane.xlu0 %1852 }
 0x473   :  { %1907 = vst [vmem:[#allocation7 + $0x38] sm:$0xff] %v1891_v43  ;;  %2738 = vrcp.f32 %v1853_v45 }
 0x474   :  { %v2733_v49 = vpop.eup %2732  ;;  %1904 = vst [vmem:[#allocation7 + $0x20] sm:$0xff] %v1888_v8 }
 0x475   :  { %v1889_v10 = vmul.f32 %v2733_v49, %v3139_v25  ;;  %v1855_v21 = vpop.xlane.xlu1 %1854 }
 0x476   :  { %2740 = vrcp.f32 %v1855_v21 }
 0x477   :  { %1905 = vst [vmem:[#allocation7 + $0x28] sm:$0xff] %v1889_v10 }
 0x47b   :  { %v2735_v9 = vpop.eup %2734 }
 0x47c   :  { %v1894_v59 = vmul.f32 %v2735_v9, %v3142_v26 }
 0x47e   :  { %1910 = vst [vmem:[#allocation7 + $0x50] sm:$0xff] %v1894_v59 }
 0x47f   :  { %v2737_v18 = vpop.eup %2736 }
 0x480   :  { %v2739_v19 = vpop.eup %2738  ;;  %v1895_v24 = vmul.f32 %v2737_v18, %v3146_v29  ;;  %v1861_v22 = vpop.xlane.xlu0 %1860 }
 0x481   :  { %v1892_v28 = vmul.f32 %v2739_v19, %v3148_v32  ;;  %2742 = vrcp.f32 %v1861_v22 }
 0x482   :  { %1911 = vst [vmem:[#allocation7 + $0x58] sm:$0xff] %v1895_v24 }
 0x483   :  { %v2741_v30 = vpop.eup %2740  ;;  %1908 = vst [vmem:[#allocation7 + $0x40] sm:$0xff] %v1892_v28 }
 0x484   :  { %v1893_v2 = vmul.f32 %v2741_v30, %v3154_v27  ;;  %v1863_v5 = vpop.xlane.xlu1 %1862 }
 0x485   :  { %2744 = vrcp.f32 %v1863_v5  ;;  %v1865_v31 = vpop.xlane.xlu0 %1864 }
 0x486   :  { %1909 = vst [vmem:[#allocation7 + $0x48] sm:$0xff] %v1893_v2  ;;  %2746 = vrcp.f32 %v1865_v31 }
 0x488   :  { %v1867_v50 = vpop.xlane.xlu1 %1866 }
 0x489   :  { %2748 = vrcp.f32 %v1867_v50 }
 0x48e   :  { %v2743_v53 = vpop.eup %2742 }
 0x48f   :  { %v1896_v3 = vmul.f32 %v2743_v53, %v3158_v47 }
 0x491   :  { %1912 = vst [vmem:[#allocation7 + $0x60] sm:$0xff] %v1896_v3 }
 0x492   :  { %v2745_v25 = vpop.eup %2744 }
 0x493   :  { %v2747_v23 = vpop.eup %2746  ;;  %v1897_v26 = vmul.f32 %v2745_v25, %v3161_v44 }
 0x494   :  { %v1898_v34 = vmul.f32 %v2747_v23, %v3163_v48 }
 0x495   :  { %1913 = vst [vmem:[#allocation7 + $0x68] sm:$0xff] %v1897_v26 }
 0x496   :  { %v2749_v42 = vpop.eup %2748  ;;  %1914 = vst [vmem:[#allocation7 + $0x70] sm:$0xff] %v1898_v34 }
 0x497   :  { %v1899_v29 = vmul.f32 %v2749_v42, %v3167_v54 }
 0x499   :  { %1915 = vst [vmem:[#allocation7 + $0x78] sm:$0xff] %v1899_v29 }
 0x49a   :  { %2801 = shalt.err (!%p2798_p0)
}
 0x49b   :  { %s2823_s16 = smov 128   ;;  %s2824_s17 = smov 8  }
 0x49c   :  { %1927 = dma.vmem_to_hbm [thread:$0]  %s1922_s1, 2048, %s3196_s7, [#allocation4], %s2823_s16, %s2823_s16, %s2824_s17  }
 0x49d   :  { %2814 = dma.done.wait [#allocation4], 2048  }
 0x49e   :  { %2815 = vsyncadd [#allocation4], 4294965248 }
 0x49f   :  { %1931 = vsyncpa [#allocation3], 1 }
 0x4a0   :  { %1932 = vsyncpa [#allocation6], 1 }
 0x4a1   :  { %1933 = vsyncpa [#allocation4], 1 }

</bundles_post_ra>
